<compile_context>
chip_gen: v7x
topology: tpu7x:2x2x1
jax: 0.10.0
libtpu: 0.0.40
codegen_flags: <defaults>
</compile_context>

<pallas_src>
import jax
import jax.numpy as jnp
from jax.experimental import pallas as pl
from jax.experimental.pallas import tpu as pltpu


# ---------------------------------------------------------------------------
# Kernels
# ---------------------------------------------------------------------------
def _fused_kernel(x_ref, w1_ref, tbias_ref, w2_ref, b2_ref, o_ref):
    """Small-model fast path: both weights VMEM-resident, single grid step."""
    h = jnp.maximum(
        jnp.dot(x_ref[...], w1_ref[...], preferred_element_type=jnp.float32)
        + tbias_ref[...], 0.0).astype(jnp.bfloat16)
    o_ref[...] = (jnp.dot(h, w2_ref[...], preferred_element_type=jnp.float32)
                  + b2_ref[...]).astype(o_ref.dtype)


def _hidden_kernel(x_ref, w1_ref, tbias_ref, h_ref, acc_ref):
    """h[:, htile] = relu(x @ W1[:, htile] + tbias[:, htile]); K streamed."""
    k = pl.program_id(1)

    @pl.when(k == 0)
    def _():
        acc_ref[...] = tbias_ref[...]                      # init with time bias

    acc_ref[...] += jnp.dot(x_ref[...], w1_ref[...],
                            preferred_element_type=jnp.float32)

    @pl.when(k == pl.num_programs(1) - 1)
    def _():
        h_ref[...] = jnp.maximum(acc_ref[...], 0.0).astype(h_ref.dtype)


def _output_kernel(h_ref, w2_ref, b2_ref, o_ref):
    """v[:, ntile] = h @ W2[:, ntile] + b2[:, ntile] (fully parallel tiles)."""
    o_ref[...] = (jnp.dot(h_ref[...], w2_ref[...],
                          preferred_element_type=jnp.float32)
                  + b2_ref[...]).astype(o_ref.dtype)


# ---------------------------------------------------------------------------
# Host-side helpers
# ---------------------------------------------------------------------------
def _time_bias(t, wt, b1):
    """Sinusoidal time embedding + projection (tiny; plain JAX, f32)."""
    emb = wt.shape[0]
    half = emb // 2
    k = jnp.arange(half, dtype=jnp.float32)
    freqs = jnp.exp(-jnp.log(10000.0) * k / half)
    ang = t[:, None].astype(jnp.float32) * freqs[None, :]
    temb = jnp.concatenate([jnp.sin(ang), jnp.cos(ang)], axis=-1)
    return temb @ wt.astype(jnp.float32) + b1.astype(jnp.float32)


def _round_up(x, m):
    return -(-x // m) * m


def _choose_tile(dim, bytes_per_col, target_bytes, min_tiles=1):
    """Largest multiple-of-128 tile dividing `dim` near `target_bytes`."""
    assert dim % 128 == 0
    t = (target_bytes // max(bytes_per_col, 1)) // 128 * 128
    t = max(128, min(t, dim))
    if min_tiles > 1:
        t = min(t, max(128, (dim // min_tiles) // 128 * 128))
    while dim % t != 0:
        t -= 128
    return t


def _vmem_capacity_bytes():
    """Per-core VMEM capacity; conservative (v7x) fallback if unknown."""
    try:
        info = pltpu.get_tpu_info()
        cap = getattr(info, "vmem_capacity_bytes", None)
        if cap:
            return int(cap)
    except Exception:
        pass
    try:
        kind = jax.devices()[0].device_kind.lower()
        if "v5" in kind or "v6" in kind:
            return 128 << 20
    except Exception:
        pass
    return 64 << 20


# ---------------------------------------------------------------------------
# Wrapper
# ---------------------------------------------------------------------------
def velocity_estim_pallas(x_t, t, params, *, tile_n=None, tile_k=None,
                          force_streaming=False):
    """Pallas-backed velocity estimator: [B,C,H,W], [B] -> [B,C,H,W]."""
    B, C, H, W = x_t.shape
    D = C * H * W

    # Weights should already be stored bf16 (init_params does this), so these
    # astype calls are no-ops and add no per-forward HBM traffic.
    w1 = params["w1"].astype(jnp.bfloat16)       # [D, hid]
    wt = params["wt"].astype(jnp.float32)        # [emb, hid] (host-side only)
    b1 = params["b1"].astype(jnp.float32)        # [1, hid]   (host-side only)
    w2 = params["w2"].astype(jnp.bfloat16)       # [hid, D]
    b2 = params["b2"].astype(jnp.float32)        # [1, D]
    hid = w1.shape[1]

    # Pad to hardware-native extents: batch -> mult of 16 (bf16 (16,128) tile),
    # D/hid -> mult of 128 (lane dim).  Zero-padding never changes the result
    # (zero rows/cols of x/W1/W2/tbias/b2 contribute nothing) and is sliced
    # off before returning.  Zero-width pads are free.
    Bp = max(16, _round_up(B, 16))
    Dp = _round_up(D, 128)
    hidp = _round_up(hid, 128)

    x2d = jnp.pad(x_t.reshape(B, D).astype(jnp.bfloat16),
                  ((0, Bp - B), (0, Dp - D)))
    tp = jnp.pad(t.astype(jnp.float32), (0, Bp - B))
    tbias = jnp.pad(_time_bias(tp, wt, b1), ((0, 0), (0, hidp - hid)))  # f32

    w1 = jnp.pad(w1, ((0, Dp - D), (0, hidp - hid)))
    w2 = jnp.pad(w2, ((0, hidp - hid), (0, Dp - D)))
    b2 = jnp.pad(b2, ((0, 0), (0, Dp - D)))

    # Generation-aware budgets (v5e/v6e: 128 MiB VMEM, v7x: 64 MiB per core).
    vmem_cap = _vmem_capacity_bytes()
    big_vmem = vmem_cap >= (100 << 20)
    stripe_target = (16 << 20) if big_vmem else (8 << 20)
    vmem_limit = (64 << 20) if big_vmem else (44 << 20)
    fast_path_limit = (32 << 20) if big_vmem else (16 << 20)

    weight_bytes = (Dp * hidp + hidp * Dp) * 2   # both weights, bf16

    # ---------------- small-model fast path: one fused resident call --------
    if not force_streaming and weight_bytes <= fast_path_limit:
        out = pl.pallas_call(
            _fused_kernel,
            out_shape=jax.ShapeDtypeStruct((Bp, Dp), jnp.float32),
            grid_spec=pltpu.PrefetchScalarGridSpec(
                num_scalar_prefetch=0,
                grid=(1,),
                in_specs=[
                    pl.BlockSpec((Bp, Dp), lambda i: (0, 0)),       # x
                    pl.BlockSpec((Dp, hidp), lambda i: (0, 0)),     # W1
                    pl.BlockSpec((Bp, hidp), lambda i: (0, 0)),     # time bias
                    pl.BlockSpec((hidp, Dp), lambda i: (0, 0)),     # W2
                    pl.BlockSpec((1, Dp), lambda i: (0, 0)),        # b2
                ],
                out_specs=pl.BlockSpec((Bp, Dp), lambda i: (0, 0)),
            ),
            compiler_params=pltpu.CompilerParams(
                dimension_semantics=("arbitrary",),
                vmem_limit_bytes=vmem_limit),
        )(x2d, w1, tbias, w2, b2)
        return out[:B, :D].reshape(B, C, H, W)

    # ---------------- streaming path (large weights) -------------------------
    # 2-way hid split when possible so v7x shards pass 1 over both cores.
    tile_h = hidp // 2 if hidp % 256 == 0 else hidp
    if tile_k is None:
        tile_k = _choose_tile(Dp, tile_h * 2, stripe_target)            # W1 stripe
    if tile_n is None:
        tile_n = _choose_tile(Dp, hidp * 2, stripe_target, min_tiles=2)  # W2 tile
    assert Dp % tile_k == 0 and Dp % tile_n == 0 and hidp % tile_h == 0

    # Pass 1: K-streamed reduction into a resident f32 accumulator per h-tile.
    h = pl.pallas_call(
        _hidden_kernel,
        out_shape=jax.ShapeDtypeStruct((Bp, hidp), jnp.bfloat16),
        grid_spec=pltpu.PrefetchScalarGridSpec(
            num_scalar_prefetch=0,
            grid=(hidp // tile_h, Dp // tile_k),
            in_specs=[
                pl.BlockSpec((Bp, tile_k), lambda hi, ki: (0, ki)),      # x stripe
                pl.BlockSpec((tile_k, tile_h), lambda hi, ki: (ki, hi)),  # W1 stripe
                pl.BlockSpec((Bp, tile_h), lambda hi, ki: (0, hi)),       # time bias
            ],
            out_specs=pl.BlockSpec((Bp, tile_h), lambda hi, ki: (0, hi)),
            scratch_shapes=[pltpu.VMEM((Bp, tile_h), jnp.float32)],
        ),
        compiler_params=pltpu.CompilerParams(
            dimension_semantics=("parallel", "arbitrary"),
            vmem_limit_bytes=vmem_limit),
    )(x2d, w1, tbias)

    # Pass 2: N-tiled output matmul; >= 2 tiles so both v7x cores participate.
    out = pl.pallas_call(
        _output_kernel,
        out_shape=jax.ShapeDtypeStruct((Bp, Dp), jnp.float32),
        grid_spec=pltpu.PrefetchScalarGridSpec(
            num_scalar_prefetch=0,
            grid=(Dp // tile_n,),
            in_specs=[
                pl.BlockSpec((Bp, hidp), lambda j: (0, 0)),       # h (small)
                pl.BlockSpec((hidp, tile_n), lambda j: (0, j)),   # W2 tile
                pl.BlockSpec((1, tile_n), lambda j: (0, j)),      # b2 tile
            ],
            out_specs=pl.BlockSpec((Bp, tile_n), lambda j: (0, j)),
        ),
        compiler_params=pltpu.CompilerParams(
            dimension_semantics=("parallel",),
            vmem_limit_bytes=vmem_limit),
    )(h, w2, b2)

    return out[:B, :D].reshape(B, C, H, W)


def init_params(key, d, hid, emb):
    """Deterministic synthetic weights; big matrices stored in bf16 up front."""
    k1, k2, k3 = jax.random.split(key, 3)
    return dict(
        w1=(jax.random.normal(k1, (d, hid), jnp.float32)
            / jnp.sqrt(d)).astype(jnp.bfloat16),
        wt=jax.random.normal(k2, (emb, hid), jnp.float32) / jnp.sqrt(emb),
        b1=jnp.zeros((1, hid), jnp.float32),
        w2=(jax.random.normal(k3, (hid, d), jnp.float32)
            / jnp.sqrt(hid)).astype(jnp.bfloat16),
        b2=jnp.zeros((1, d), jnp.float32),
    )


class RectifiedFlow:
    """JAX/Pallas port of RectifiedFlow: forward == velocity == estimator(x_t, t)."""

    def __init__(self, params):
        self.params = params

    def forward(self, x_t, t, **kwargs):
        return velocity_estim_pallas(x_t, t, self.params, **kwargs)

    def velocity(self, x_t, t, **kwargs):
        return self.forward(x_t, t, **kwargs)

    # TODO(synk): loss/sample/reflow/distillation are training/sampling loops
    # (optimizer, Euler solver); host-side orchestration, not kernel hot paths.


def _reference_forward(x_t, t, params):
    """Pure-JAX reference with matching bf16-weight / f32-accumulate numerics."""
    B, C, H, W = x_t.shape
    D = C * H * W
    x = x_t.reshape(B, D).astype(jnp.bfloat16)
    tbias = _time_bias(t.astype(jnp.float32),
                       params["wt"].astype(jnp.float32),
                       params["b1"].astype(jnp.float32))
    h = jnp.maximum(
        jnp.dot(x, params["w1"].astype(jnp.bfloat16),
                preferred_element_type=jnp.float32) + tbias, 0.0)
    v = (jnp.dot(h.astype(jnp.bfloat16), params["w2"].astype(jnp.bfloat16),
                 preferred_element_type=jnp.float32)
         + params["b2"].astype(jnp.float32))
    return v.reshape(B, C, H, W)


if __name__ == "__main__":
    B, C, H, W = 2, 4, 16, 16
    D = C * H * W          # 1024
    HID = 256
    EMB = 128

    key = jax.random.PRNGKey(0)
    kx, kt, kp = jax.random.split(key, 3)
    x_t = jax.random.normal(kx, (B, C, H, W), jnp.float32)   # noised sample
    t = jax.random.uniform(kt, (B,), jnp.float32)            # timesteps in [0,1]
    params = init_params(kp, D, HID, EMB)

    model = RectifiedFlow(params)

    # Default at this scale: small-model fast path (single fused resident call).
    out_fast = jax.block_until_ready(model.forward(x_t, t))

    # Also exercise the streaming path with small explicit tiles so the
    # multi-step K/N grids and the 2-way hid split get compiled and checked.
    out_stream = jax.block_until_ready(
        model.forward(x_t, t, force_streaming=True, tile_k=512, tile_n=512))

    ref = _reference_forward(x_t, t, params)
    assert out_fast.shape == (B, C, H, W)
    assert jnp.allclose(out_fast, ref, atol=1e-2, rtol=1e-2), \
        float(jnp.max(jnp.abs(out_fast - ref)))
    assert jnp.allclose(out_stream, ref, atol=1e-2, rtol=1e-2), \
        float(jnp.max(jnp.abs(out_stream - ref)))
    print("KERNEL_OK")
</pallas_src>

<mosaic_0001>
module attributes {stable_mosaic.version = 11 : i64} {
  func.func @_fused_kernel(%arg0: i32, %arg1: memref<16x1024xbf16, #tpu.memory_space<vmem>>, %arg2: memref<1024x256xbf16, #tpu.memory_space<vmem>>, %arg3: memref<16x256xf32, #tpu.memory_space<vmem>>, %arg4: memref<256x1024xbf16, #tpu.memory_space<vmem>>, %arg5: memref<1x1024xf32, #tpu.memory_space<vmem>>, %arg6: memref<16x1024xf32, #tpu.memory_space<vmem>>) attributes {dimension_semantics = [#tpu.dimension_semantics<arbitrary>], iteration_bounds = array<i64: 1>, scalar_prefetch = 0 : i64, scratch_operands = 0 : i64, tpu.core_type = #tpu.core_type<tc>, window_params = [{pipeline_mode = #tpu.pipeline_mode<synchronous>, transform_indices = @transform_0, window_bounds = array<i64: 16, 1024>}, {pipeline_mode = #tpu.pipeline_mode<synchronous>, transform_indices = @transform_1, window_bounds = array<i64: 1024, 256>}, {pipeline_mode = #tpu.pipeline_mode<synchronous>, transform_indices = @transform_2, window_bounds = array<i64: 16, 256>}, {pipeline_mode = #tpu.pipeline_mode<synchronous>, transform_indices = @transform_3, window_bounds = array<i64: 256, 1024>}, {pipeline_mode = #tpu.pipeline_mode<synchronous>, transform_indices = @transform_4, window_bounds = array<i64: 1, 1024>}, {pipeline_mode = #tpu.pipeline_mode<synchronous>, transform_indices = @transform_5, window_bounds = array<i64: 16, 1024>}]} {
    %c0 = arith.constant 0 : index
    %c0_0 = arith.constant 0 : index
    %0 = vector.load %arg1[%c0, %c0_0] : memref<16x1024xbf16, #tpu.memory_space<vmem>>, vector<16x1024xbf16>
    %c0_1 = arith.constant 0 : index
    %c0_2 = arith.constant 0 : index
    %1 = vector.load %arg2[%c0_1, %c0_2] : memref<1024x256xbf16, #tpu.memory_space<vmem>>, vector<1024x256xbf16>
    %cst = arith.constant dense<0.000000e+00> : vector<16x256xf32>
    %2 = tpu.matmul %0, %1, %cst {dimension_numbers = #tpu.dot_dimension_numbers<[1], [0], [0], [1], [0, 0, 1, 1], [], []>} : vector<16x1024xbf16>, vector<1024x256xbf16>, vector<16x256xf32> -> vector<16x256xf32>
    %c0_3 = arith.constant 0 : index
    %c0_4 = arith.constant 0 : index
    %3 = vector.load %arg3[%c0_3, %c0_4] : memref<16x256xf32, #tpu.memory_space<vmem>>, vector<16x256xf32>
    %4 = arith.addf %2, %3 : vector<16x256xf32>
    %cst_5 = arith.constant 0.000000e+00 : f32
    %5 = vector.broadcast %cst_5 : f32 to vector<16x256xf32>
    %6 = arith.maximumf %4, %5 : vector<16x256xf32>
    %7 = arith.truncf %6 : vector<16x256xf32> to vector<16x256xbf16>
    %c0_6 = arith.constant 0 : index
    %c0_7 = arith.constant 0 : index
    %8 = vector.load %arg4[%c0_6, %c0_7] : memref<256x1024xbf16, #tpu.memory_space<vmem>>, vector<256x1024xbf16>
    %cst_8 = arith.constant dense<0.000000e+00> : vector<16x1024xf32>
    %9 = tpu.matmul %7, %8, %cst_8 {dimension_numbers = #tpu.dot_dimension_numbers<[1], [0], [0], [1], [0, 0, 1, 1], [], []>} : vector<16x256xbf16>, vector<256x1024xbf16>, vector<16x1024xf32> -> vector<16x1024xf32>
    %c0_9 = arith.constant 0 : index
    %c0_10 = arith.constant 0 : index
    %10 = vector.load %arg5[%c0_9, %c0_10] : memref<1x1024xf32, #tpu.memory_space<vmem>>, vector<1x1024xf32>
    %11 = vector.broadcast %10 : vector<1x1024xf32> to vector<16x1024xf32>
    %12 = arith.addf %9, %11 : vector<16x1024xf32>
    %c0_11 = arith.constant 0 : index
    %c0_12 = arith.constant 0 : index
    %13 = vector.load %arg6[%c0_11, %c0_12] : memref<16x1024xf32, #tpu.memory_space<vmem>>, vector<16x1024xf32>
    tpu.vector_store %arg6[%c0_11, %c0_12], %12 {strides = array<i32>} : memref<16x1024xf32, #tpu.memory_space<vmem>>, vector<16x1024xf32>,
    return
  }
  func.func @transform_0(%arg0: i32) -> (i32, i32) {
    %c0_i32 = arith.constant 0 : i32
    %c0_i32_0 = arith.constant 0 : i32
    %c0_i32_1 = arith.constant 0 : i32
    return %c0_i32, %c0_i32_0 : i32, i32
  }
  func.func @transform_1(%arg0: i32) -> (i32, i32) {
    %c0_i32 = arith.constant 0 : i32
    %c0_i32_0 = arith.constant 0 : i32
    %c0_i32_1 = arith.constant 0 : i32
    return %c0_i32, %c0_i32_0 : i32, i32
  }
  func.func @transform_2(%arg0: i32) -> (i32, i32) {
    %c0_i32 = arith.constant 0 : i32
    %c0_i32_0 = arith.constant 0 : i32
    %c0_i32_1 = arith.constant 0 : i32
    return %c0_i32, %c0_i32_0 : i32, i32
  }
  func.func @transform_3(%arg0: i32) -> (i32, i32) {
    %c0_i32 = arith.constant 0 : i32
    %c0_i32_0 = arith.constant 0 : i32
    %c0_i32_1 = arith.constant 0 : i32
    return %c0_i32, %c0_i32_0 : i32, i32
  }
  func.func @transform_4(%arg0: i32) -> (i32, i32) {
    %c0_i32 = arith.constant 0 : i32
    %c0_i32_0 = arith.constant 0 : i32
    %c0_i32_1 = arith.constant 0 : i32
    return %c0_i32, %c0_i32_0 : i32, i32
  }
  func.func @transform_5(%arg0: i32) -> (i32, i32) {
    %c0_i32 = arith.constant 0 : i32
    %c0_i32_0 = arith.constant 0 : i32
    %c0_i32_1 = arith.constant 0 : i32
    return %c0_i32, %c0_i32_0 : i32, i32
  }
}

</mosaic_0001>

<bundles_post_ra>
// kernel: tpu_custom_call.1
= control target key start
LH: loop header
LB: loop body
LE: loop exit
PB: predicated region body
PF: predicated region fallthrough
CT: control target
= control target key end

     0   :  { %10 = vsyncpa [#allocation3], 0  ;;  %s2842_s0 = inlined_call_operand.hbm [shape: bf16[16,1024], index: 0, kind: input, shape index: {}]   ;;  %s2843_s1 = inlined_call_operand.hbm [shape: bf16[1024,256], index: 1, kind: input, shape index: {}]   ;;  %s2844_s2 = inlined_call_operand.hbm [shape: f32[16,256], index: 2, kind: input, shape index: {}]   ;;  %s2845_s3 = inlined_call_operand.hbm [shape: bf16[256,1024], index: 3, kind: input, shape index: {}]   ;;  %s2846_s4 = inlined_call_operand.vmem [shape: f32[1,1024], index: 4, kind: input, shape index: {}]   ;;  %s2847_s5 = inlined_call_operand.hbm [shape: f32[16,1024], index: 5, kind: output, shape index: {}]  }
   0x1   :  { %11 = vsyncpa [#allocation6], 0 }
   0x2   :  { %12 = vsyncpa [#allocation9], 0 }
   0x3   :  { %13 = vsyncpa [#allocation4], 0  ;;  %s2694_s18 = smov [#allocation5]   ;;  %s2576_s22 = scalar_lea.hbm %s2843_s1, 16384 }
   0x4   :  { %s31_s19 = sshll.u32 %s2694_s18, 4  ;;  %p2577_p0 = scmp.ne.s32.totalorder %s2843_s1, %s2576_s22  ;;  %s32_s19 = int_to_ptr.vmem [resolvable:$true] %s31_s19 }
   0x5   :  { %p2580_p1 = scmp.lt.u32.totalorder %s2576_s22, %s2843_s1 }
   0x7   :  { %p2582_p2 = pnand %p2580_p1, %p2577_p0 }
   0x9   :  { %2585 = shalt.err (!%p2582_p2)
}
   0xa   :  { %s2586_s27 = scalar_lea.vmem %s32_s19, 16384  ;;  %p2591_p4 = scmp.lt.s32.totalorder %s32_s19, %s32_s19 }
   0xb   :  { %p2587_p3 = scmp.ne.s32.totalorder %s32_s19, %s2586_s27  ;;  %p2592_p5 = scmp.lt.s32.totalorder %s2586_s27, %s2586_s27 }
   0xd   :  { %p2593_p6 = por %p2592_p5, %p2591_p4 }
   0xf   :  { %p2594_p7 = pnand %p2593_p6, %p2587_p3 }
  0x11   :  { %2597 = shalt.err (!%p2594_p7)
}
  0x12   :  { %s2695_s28 = smov 128   ;;  %s2696_s29 = smov 8  }
  0x13   :  { %37 = dma.hbm_to_vmem [thread:$0]  %s2843_s1, 16384, %s32_s19, [#allocation6], %s2695_s28, %s2695_s28, %s2696_s29  }
  0x14   :  { %s2697_s7 = smov [#allocation2]   ;;  %s2598_s11 = scalar_lea.hbm %s2842_s0, 1024 }
  0x15   :  { %s19_s8 = sshll.u32 %s2697_s7, 4  ;;  %p2599_p8 = scmp.ne.s32.totalorder %s2842_s0, %s2598_s11  ;;  %s20_s8 = int_to_ptr.vmem [resolvable:$true] %s19_s8 }
  0x16   :  { %p2602_p9 = scmp.lt.u32.totalorder %s2598_s11, %s2842_s0 }
  0x18   :  { %p2604_p10 = pnand %p2602_p9, %p2599_p8 }
  0x1a   :  { %2607 = shalt.err (!%p2604_p10)
}
  0x1b   :  { %s2608_s16 = scalar_lea.vmem %s20_s8, 1024  ;;  %p2613_p12 = scmp.lt.s32.totalorder %s20_s8, %s20_s8 }
  0x1c   :  { %p2609_p11 = scmp.ne.s32.totalorder %s20_s8, %s2608_s16  ;;  %p2614_p13 = scmp.lt.s32.totalorder %s2608_s16, %s2608_s16 }
  0x1e   :  { %p2615_p0 = por %p2614_p13, %p2613_p12 }
  0x20   :  { %p2616_p1 = pnand %p2615_p0, %p2609_p11 }
  0x22   :  { %2619 = shalt.err (!%p2616_p1)
}
  0x23   :  { %s2698_s1 = smov 512   ;;  %s2699_s17 = smov 32  }
  0x24   :  { %25 = dma.hbm_to_vmem [thread:$0]  %s2842_s0, 1024, %s20_s8, [#allocation3], %s2698_s1, %s2698_s1, %s2699_s17  }
  0x25   :  { %s2700_s20 = smov [#allocation7]   ;;  %s2620_s24 = scalar_lea.hbm %s2844_s2, 512 }
  0x26   :  { %s43_s21 = sshll.u32 %s2700_s20, 4  ;;  %p2621_p2 = scmp.ne.s32.totalorder %s2844_s2, %s2620_s24  ;;  %s44_s21 = int_to_ptr.vmem [resolvable:$true] %s43_s21 }
  0x27   :  { %p2624_p3 = scmp.lt.u32.totalorder %s2620_s24, %s2844_s2 }
  0x29   :  { %p2626_p4 = pnand %p2624_p3, %p2621_p2 }
  0x2b   :  { %2629 = shalt.err (!%p2626_p4)
}
  0x2c   :  { %s2630_s29 = scalar_lea.vmem %s44_s21, 512  ;;  %p2635_p6 = scmp.lt.s32.totalorder %s44_s21, %s44_s21 }
  0x2d   :  { %p2631_p5 = scmp.ne.s32.totalorder %s44_s21, %s2630_s29  ;;  %p2636_p7 = scmp.lt.s32.totalorder %s2630_s29, %s2630_s29 }
  0x2f   :  { %p2637_p8 = por %p2636_p7, %p2635_p6 }
  0x31   :  { %p2638_p9 = pnand %p2637_p8, %p2631_p5 }
  0x33   :  { %2641 = shalt.err (!%p2638_p9)
}
  0x34   :  { %s2701_s0 = smov 256   ;;  %s2702_s30 = smov 16  }
  0x35   :  { %49 = dma.hbm_to_vmem [thread:$0]  %s2844_s2, 512, %s44_s21, [#allocation6], %s2701_s0, %s2701_s0, %s2702_s30  }
  0x36   :  { %s2703_s8 = smov [#allocation8]   ;;  %s2642_s12 = scalar_lea.hbm %s2845_s3, 16384 }
  0x37   :  { %s55_s9 = sshll.u32 %s2703_s8, 4  ;;  %p2643_p10 = scmp.ne.s32.totalorder %s2845_s3, %s2642_s12  ;;  %s56_s9 = int_to_ptr.vmem [resolvable:$true] %s55_s9 }
  0x38   :  { %p2646_p11 = scmp.lt.u32.totalorder %s2642_s12, %s2845_s3 }
  0x3a   :  { %p2648_p12 = pnand %p2646_p11, %p2643_p10 }
  0x3c   :  { %2651 = shalt.err (!%p2648_p12)
}
  0x3d   :  { %s2652_s18 = scalar_lea.vmem %s56_s9, 16384  ;;  %p2657_p0 = scmp.lt.s32.totalorder %s56_s9, %s56_s9 }
  0x3e   :  { %p2653_p13 = scmp.ne.s32.totalorder %s56_s9, %s2652_s18  ;;  %p2658_p1 = scmp.lt.s32.totalorder %s2652_s18, %s2652_s18 }
  0x40   :  { %p2659_p2 = por %p2658_p1, %p2657_p0 }
  0x42   :  { %p2660_p3 = pnand %p2659_p2, %p2653_p13 }
  0x44   :  { %2663 = shalt.err (!%p2660_p3)
}
  0x45   :  { %61 = dma.hbm_to_vmem [thread:$0]  %s2845_s3, 16384, %s56_s9, [#allocation9], %s2698_s1, %s2698_s1, %s2699_s17  }
  0x46   :  { %2686 = dma.done.wait [#allocation3], 1024  }
  0x47   :  { %2687 = vsyncadd [#allocation3], 4294966272 }
  0x48   :  { %2688 = dma.done.wait [#allocation6], 16896  }
  0x49   :  { %2689 = vsyncadd [#allocation6], 4294950400 }
  0x4a   :  { %2690 = dma.done.wait [#allocation9], 16384  }
  0x4b   :  { %2691 = vsyncadd [#allocation9], 4294950912  ;;  %v2384_v0 = vld [vmem:[#allocation5 + $0x4] ss:$8 sps:$4 sm:$0xff]   ;;  %v2386_v1 = vld [vmem:[#allocation5] ss:$8 sps:$4 sm:$0xff]  }
  0x4c   :  { %896 = vmatprep.subr.bf16.mxu0 %v2384_v0  ;;  %v2387_v2 = vld [vmem:[#allocation5 + $0x14] ss:$8 sps:$4 sm:$0xff]   ;;  %v2389_v3 = vld [vmem:[#allocation5 + $0x10] ss:$8 sps:$4 sm:$0xff]   ;;  %v2390_v4 = vld [vmem:[#allocation5 + $0x24] ss:$8 sps:$4 sm:$0xff]  }
  0x4d   :  { %897 = vmatpush1.bf16.msra.mxu0 %v2386_v1  ;;  %v2392_v5 = vld [vmem:[#allocation5 + $0x20] ss:$8 sps:$4 sm:$0xff]   ;;  %v2393_v6 = vld [vmem:[#allocation5 + $0x34] ss:$8 sps:$4 sm:$0xff]   ;;  %v2395_v7 = vld [vmem:[#allocation5 + $0x30] ss:$8 sps:$4 sm:$0xff]  }
  0x4e   :  { %898 = vmatprep.subr.bf16.mxu0 %v2387_v2  ;;  %v2396_v8 = vld [vmem:[#allocation5 + $0x44] ss:$8 sps:$4 sm:$0xff]   ;;  %v2398_v9 = vld [vmem:[#allocation5 + $0x40] ss:$8 sps:$4 sm:$0xff]   ;;  %v2399_v10 = vld [vmem:[#allocation5 + $0x54] ss:$8 sps:$4 sm:$0xff]  }
  0x4f   :  { %v2401_v11 = vld [vmem:[#allocation5 + $0x50] ss:$8 sps:$4 sm:$0xff]   ;;  %v2402_v12 = vld [vmem:[#allocation5 + $0x64] ss:$8 sps:$4 sm:$0xff]   ;;  %v2404_v16 = vld [vmem:[#allocation5 + $0x60] ss:$8 sps:$4 sm:$0xff]  }
  0x50   :  { %v76_v13 = vld [vmem:[#allocation2] sm:$0xff]  ;;  %v2405_v17 = vld [vmem:[#allocation5 + $0x74] ss:$8 sps:$4 sm:$0xff]   ;;  %v2407_v18 = vld [vmem:[#allocation5 + $0x70] ss:$8 sps:$4 sm:$0xff]  }
  0x51   :  { %899 = vmatpush1.bf16.msra.mxu0 %v2389_v3  ;;  %v80_v14 = vld [vmem:[#allocation2 + $0x20] sm:$0xff]  ;;  %v2411_v21 = vld [vmem:[#allocation5 + $0x94] ss:$8 sps:$4 sm:$0xff]   ;;  %v2413_v22 = vld [vmem:[#allocation5 + $0x90] ss:$8 sps:$4 sm:$0xff]  }
  0x52   :  { %900 = vmatprep.subr.bf16.mxu0 %v2390_v4  ;;  %v2092_v15 = vcombine.high %v76_v13, %v80_v14  ;;  %v2408_v19 = vld [vmem:[#allocation5 + $0x84] ss:$8 sps:$4 sm:$0xff]   ;;  %v2410_v20 = vld [vmem:[#allocation5 + $0x80] ss:$8 sps:$4 sm:$0xff]   ;;  %v2417_v25 = vld [vmem:[#allocation5 + $0xb4] ss:$8 sps:$4 sm:$0xff]   ;;  %v2091_v38 = vcombine.low %v76_v13, %v80_v14 }
  0x53   :  { %v2414_v23 = vld [vmem:[#allocation5 + $0xa4] ss:$8 sps:$4 sm:$0xff]   ;;  %v2416_v24 = vld [vmem:[#allocation5 + $0xa0] ss:$8 sps:$4 sm:$0xff]   ;;  %v2419_v26 = vld [vmem:[#allocation5 + $0xb0] ss:$8 sps:$4 sm:$0xff]  }
  0x54   :  { %928 = vmatprep.mubr.bf16.mxu0 %v2092_v15  ;;  %v2420_v27 = vld [vmem:[#allocation5 + $0xc4] ss:$8 sps:$4 sm:$0xff]   ;;  %v2422_v28 = vld [vmem:[#allocation5 + $0xc0] ss:$8 sps:$4 sm:$0xff]   ;;  %v2423_v29 = vld [vmem:[#allocation5 + $0xd4] ss:$8 sps:$4 sm:$0xff]  }
  0x55   :  { %901 = vmatpush1.bf16.msra.mxu0 %v2392_v5  ;;  %v2425_v30 = vld [vmem:[#allocation5 + $0xd0] ss:$8 sps:$4 sm:$0xff]   ;;  %v2426_v31 = vld [vmem:[#allocation5 + $0xe4] ss:$8 sps:$4 sm:$0xff]   ;;  %v2428_v32 = vld [vmem:[#allocation5 + $0xe0] ss:$8 sps:$4 sm:$0xff]  }
  0x56   :  { %902 = vmatprep.subr.bf16.mxu0 %v2393_v6  ;;  %v2429_v33 = vld [vmem:[#allocation5 + $0xf4] ss:$8 sps:$4 sm:$0xff]   ;;  %v2431_v34 = vld [vmem:[#allocation5 + $0xf0] ss:$8 sps:$4 sm:$0xff]   ;;  %v2434_v35 = vld [vmem:[#allocation5 + $0x104] ss:$8 sps:$4 sm:$0xff]  }
  0x57   :  { %v2791_v36 = vld [vmem:[#allocation2 + $0x8] sm:$0xff]  ;;  %v2437_v41 = vld [vmem:[#allocation5 + $0x114] ss:$8 sps:$4 sm:$0xff]   ;;  %v2435_v42 = vld [vmem:[#allocation5 + $0x110] ss:$8 sps:$4 sm:$0xff]  }
  0x58   :  { %v2793_v37 = vld [vmem:[#allocation2 + $0x28] sm:$0xff]  ;;  %v2443_v45 = vld [vmem:[#allocation5 + $0x134] ss:$8 sps:$4 sm:$0xff]   ;;  %v2441_v46 = vld [vmem:[#allocation5 + $0x130] ss:$8 sps:$4 sm:$0xff]  }
  0x59   :  { %903 = vmatpush1.bf16.msra.mxu0 %v2395_v7  ;;  %v2432_v39 = vld [vmem:[#allocation5 + $0x100] ss:$8 sps:$4 sm:$0xff]   ;;  %v2094_v40 = vcombine.high %v2791_v36, %v2793_v37  ;;  %v2440_v43 = vld [vmem:[#allocation5 + $0x124] ss:$8 sps:$4 sm:$0xff]   ;;  %v2449_v49 = vld [vmem:[#allocation5 + $0x154] ss:$8 sps:$4 sm:$0xff]  }
  0x5a   :  { %904 = vmatprep.subr.bf16.mxu0 %v2396_v8  ;;  %v2438_v44 = vld [vmem:[#allocation5 + $0x120] ss:$8 sps:$4 sm:$0xff]   ;;  %v2446_v47 = vld [vmem:[#allocation5 + $0x144] ss:$8 sps:$4 sm:$0xff]   ;;  %v2447_v50 = vld [vmem:[#allocation5 + $0x150] ss:$8 sps:$4 sm:$0xff]  }
  0x5b   :  { %v2444_v48 = vld [vmem:[#allocation5 + $0x140] ss:$8 sps:$4 sm:$0xff]   ;;  %v2452_v51 = vld [vmem:[#allocation5 + $0x164] ss:$8 sps:$4 sm:$0xff]   ;;  %v2455_v53 = vld [vmem:[#allocation5 + $0x174] ss:$8 sps:$4 sm:$0xff]  }
  0x5c   :  { %v2450_v52 = vld [vmem:[#allocation5 + $0x160] ss:$8 sps:$4 sm:$0xff]   ;;  %v2453_v54 = vld [vmem:[#allocation5 + $0x170] ss:$8 sps:$4 sm:$0xff]   ;;  %v2458_v55 = vld [vmem:[#allocation5 + $0x184] ss:$8 sps:$4 sm:$0xff]  }
  0x5d   :  { %905 = vmatpush1.bf16.msra.mxu0 %v2398_v9  ;;  %v2456_v56 = vld [vmem:[#allocation5 + $0x180] ss:$8 sps:$4 sm:$0xff]   ;;  %v2461_v57 = vld [vmem:[#allocation5 + $0x194] ss:$8 sps:$4 sm:$0xff]   ;;  %v2459_v58 = vld [vmem:[#allocation5 + $0x190] ss:$8 sps:$4 sm:$0xff]  }
  0x5e   :  { %906 = vmatprep.subr.bf16.mxu0 %v2399_v10  ;;  %v2464_v59 = vld [vmem:[#allocation5 + $0x1a4] ss:$8 sps:$4 sm:$0xff]   ;;  %v2462_v60 = vld [vmem:[#allocation5 + $0x1a0] ss:$8 sps:$4 sm:$0xff]   ;;  %v2467_v61 = vld [vmem:[#allocation5 + $0x1b4] ss:$8 sps:$4 sm:$0xff]   ;;  %v2093_v10 = vcombine.low %v2791_v36, %v2793_v37 }
  0x5f   :  { %v2465_v62 = vld [vmem:[#allocation5 + $0x1b0] ss:$8 sps:$4 sm:$0xff]   ;;  %v2470_v63 = vld [vmem:[#allocation5 + $0x1c4] ss:$8 sps:$4 sm:$0xff]   ;;  %v2468_v0 = vld [vmem:[#allocation5 + $0x1c0] ss:$8 sps:$4 sm:$0xff]  }
  0x60   :  { %v2473_v1 = vld [vmem:[#allocation5 + $0x1d4] ss:$8 sps:$4 sm:$0xff]   ;;  %v2471_v2 = vld [vmem:[#allocation5 + $0x1d0] ss:$8 sps:$4 sm:$0xff]   ;;  %v2476_v3 = vld [vmem:[#allocation5 + $0x1e4] ss:$8 sps:$4 sm:$0xff]  }
  0x61   :  { %907 = vmatpush1.bf16.msra.mxu0 %v2401_v11  ;;  %v2474_v4 = vld [vmem:[#allocation5 + $0x1e0] ss:$8 sps:$4 sm:$0xff]   ;;  %v2479_v5 = vld [vmem:[#allocation5 + $0x1f4] ss:$8 sps:$4 sm:$0xff]   ;;  %v2477_v6 = vld [vmem:[#allocation5 + $0x1f0] ss:$8 sps:$4 sm:$0xff]  }
  0x62   :  { %908 = vmatprep.subr.bf16.mxu0 %v2402_v12  ;;  %v2482_v7 = vld [vmem:[#allocation5 + $0x204] ss:$8 sps:$4 sm:$0xff]   ;;  %v2797_v8 = vld [vmem:[#allocation2 + $0x10] sm:$0xff]  ;;  %v2480_v11 = vld [vmem:[#allocation5 + $0x200] ss:$8 sps:$4 sm:$0xff]  }
  0x63   :  { %v2799_v9 = vld [vmem:[#allocation2 + $0x30] sm:$0xff]  ;;  %v1074_v14 = vld [vmem:[#allocation8] sm:$0xff] }
  0x64   :  { %v2096_v12 = vcombine.high %v2797_v8, %v2799_v9  ;;  %v2485_v13 = vld [vmem:[#allocation5 + $0x214] ss:$8 sps:$4 sm:$0xff]   ;;  %v1078_v15 = vld [vmem:[#allocation8 + $0x20] sm:$0xff] }
  0x65   :  { %909 = vmatpush1.bf16.msra.mxu0 %v2404_v16  ;;  %v1082_v16 = vld [vmem:[#allocation8 + $0x40] sm:$0xff] }
  0x66   :  { %910 = vmatprep.subr.bf16.mxu0 %v2405_v17  ;;  %v2483_v17 = vld [vmem:[#allocation5 + $0x210] ss:$8 sps:$4 sm:$0xff]   ;;  %v1110_v36 = vld [vmem:[#allocation8 + $0x120] sm:$0xff] }
  0x69   :  { %911 = vmatpush1.bf16.msra.mxu0 %v2407_v18  ;;  %v2228_v18 = vcombine.high %v1074_v14, %v1078_v15 }
  0x6a   :  { %912 = vmatprep.subr.bf16.mxu0 %v2408_v19  ;;  %v2227_v19 = vcombine.low %v1074_v14, %v1078_v15  ;;  %v2515_v14 = vld [vmem:[#allocation5 + $0x2b4] ss:$8 sps:$4 sm:$0xff]   ;;  %v1162_v15 = vld [vmem:[#allocation8 + $0x2c0] sm:$0xff] }
  0x6b   :  { %1884 = vmatprep.subr.bf16.mxu1 %v2228_v18  ;;  %v2513_v18 = vld [vmem:[#allocation5 + $0x2b0] ss:$8 sps:$4 sm:$0xff]  }
  0x6c   :  { %1885 = vmatpush1.bf16.msra.mxu1 %v2227_v19 }
  0x6d   :  { %913 = vmatpush1.bf16.msra.mxu0 %v2410_v20  ;;  %v1086_v20 = vld [vmem:[#allocation8 + $0x60] sm:$0xff] }
  0x6e   :  { %914 = vmatprep.subr.bf16.mxu0 %v2411_v21  ;;  %v2488_v21 = vld [vmem:[#allocation5 + $0x224] ss:$8 sps:$4 sm:$0xff]  }
  0x71   :  { %915 = vmatpush1.bf16.msra.mxu0 %v2413_v22  ;;  %v2236_v22 = vcombine.high %v1082_v16, %v1086_v20 }
  0x72   :  { %916 = vmatprep.subr.bf16.mxu0 %v2414_v23  ;;  %v1090_v23 = vld [vmem:[#allocation8 + $0x80] sm:$0xff] }
  0x73   :  { %1886 = vmatprep.subr.bf16.mxu1 %v2236_v22  ;;  %v1174_v22 = vld [vmem:[#allocation8 + $0x320] sm:$0xff] }
  0x75   :  { %917 = vmatpush1.bf16.msra.mxu0 %v2416_v24  ;;  %v1094_v24 = vld [vmem:[#allocation8 + $0xa0] sm:$0xff] }
  0x76   :  { %918 = vmatprep.subr.bf16.mxu0 %v2417_v25  ;;  %v2235_v25 = vcombine.low %v1082_v16, %v1086_v20  ;;  %v1166_v16 = vld [vmem:[#allocation8 + $0x2e0] sm:$0xff] }
  0x77   :  { %v2316_v19 = vcombine.high %v1162_v15, %v1166_v16  ;;  %v2518_v20 = vld [vmem:[#allocation5 + $0x2c4] ss:$8 sps:$4 sm:$0xff]  }
  0x78   :  { %1887 = vmatpush1.bf16.msra.mxu1 %v2235_v25 }
  0x79   :  { %919 = vmatpush1.bf16.msra.mxu0 %v2419_v26  ;;  %v2486_v26 = vld [vmem:[#allocation5 + $0x220] ss:$8 sps:$4 sm:$0xff]  }
  0x7a   :  { %920 = vmatprep.subr.bf16.mxu0 %v2420_v27  ;;  %v2244_v27 = vcombine.high %v1090_v23, %v1094_v24 }
  0x7c   :  { %1888 = vmatprep.subr.bf16.mxu1 %v2244_v27  ;;  %v1178_v27 = vld [vmem:[#allocation8 + $0x340] sm:$0xff] }
  0x7d   :  { %921 = vmatpush1.bf16.msra.mxu0 %v2422_v28  ;;  %v2491_v28 = vld [vmem:[#allocation5 + $0x234] ss:$8 sps:$4 sm:$0xff]  }
  0x7e   :  { %922 = vmatprep.subr.bf16.mxu0 %v2423_v29  ;;  %v1098_v29 = vld [vmem:[#allocation8 + $0xc0] sm:$0xff] }
  0x81   :  { %923 = vmatpush1.bf16.msra.mxu0 %v2425_v30  ;;  %v1102_v30 = vld [vmem:[#allocation8 + $0xe0] sm:$0xff] }
  0x82   :  { %924 = vmatprep.subr.bf16.mxu0 %v2426_v31  ;;  %v2243_v31 = vcombine.low %v1090_v23, %v1094_v24  ;;  %v2251_v37 = vcombine.low %v1098_v29, %v1102_v30  ;;  %v2315_v23 = vcombine.low %v1162_v15, %v1166_v16  ;;  %v2516_v24 = vld [vmem:[#allocation5 + $0x2c0] ss:$8 sps:$4 sm:$0xff]  }
  0x83   :  { %v1198_v15 = vld [vmem:[#allocation8 + $0x3e0] sm:$0xff] }
  0x84   :  { %1889 = vmatpush1.bf16.msra.mxu1 %v2243_v31 }
  0x85   :  { %925 = vmatpush1.bf16.msra.mxu0 %v2428_v32  ;;  %v2489_v32 = vld [vmem:[#allocation5 + $0x230] ss:$8 sps:$4 sm:$0xff]  }
  0x86   :  { %926 = vmatprep.subr.bf16.mxu0 %v2429_v33  ;;  %v2252_v33 = vcombine.high %v1098_v29, %v1102_v30  ;;  %v2519_v30 = vld [vmem:[#allocation5 + $0x2d0] ss:$8 sps:$4 sm:$0xff]  }
  0x88   :  { %1890 = vmatprep.subr.bf16.mxu1 %v2252_v33 }
  0x89   :  { %927 = vmatpush1.bf16.msra.mxu0 %v2431_v34  ;;  %v2494_v34 = vld [vmem:[#allocation5 + $0x244] ss:$8 sps:$4 sm:$0xff]   ;;  %1891 = vmatpush1.bf16.msra.mxu1 %v2251_v37 }
  0x8a   :  { %939 = vmatprep.subr.bf16.mxu0 %v2434_v35  ;;  %v1106_v35 = vld [vmem:[#allocation8 + $0x100] sm:$0xff] }
  0x8b   :  { %v2530_v37 = vld [vmem:[#allocation5 + $0x304] ss:$8 sps:$4 sm:$0xff]  }
  0x8c   :  { %929 = vmatmul.mubr.bf16.vlgmr.msra.gmra.mrb[0].mxu0 %v2091_v38  ;;  %v2492_v38 = vld [vmem:[#allocation5 + $0x240] ss:$8 sps:$4 sm:$0xff]  }
  0x8d   :  { %940 = vmatpush1.bf16.msra.mxu0 %v2432_v39  ;;  %971 = vmatprep.mubr.bf16.mxu0 %v2094_v40  ;;  %v2260_v39 = vcombine.high %v1106_v35, %v1110_v36  ;;  %v2497_v40 = vld [vmem:[#allocation5 + $0x254] ss:$8 sps:$4 sm:$0xff]  }
  0x8e   :  { %941 = vmatprep.subr.bf16.mxu0 %v2437_v41  ;;  %v1114_v41 = vld [vmem:[#allocation8 + $0x140] sm:$0xff] }
  0x8f   :  { %1892 = vmatprep.subr.bf16.mxu1 %v2260_v39  ;;  %v2807_v39 = vld [vmem:[#allocation2 + $0x38] sm:$0xff] }
  0x91   :  { %942 = vmatpush1.bf16.msra.mxu0 %v2435_v42  ;;  %v1118_v42 = vld [vmem:[#allocation8 + $0x160] sm:$0xff] }
  0x92   :  { %943 = vmatprep.subr.bf16.mxu0 %v2440_v43  ;;  %v2259_v43 = vcombine.low %v1106_v35, %v1110_v36  ;;  %v2527_v35 = vld [vmem:[#allocation5 + $0x2f4] ss:$8 sps:$4 sm:$0xff]   ;;  %v2525_v36 = vld [vmem:[#allocation5 + $0x2f0] ss:$8 sps:$4 sm:$0xff]  }
  0x94   :  { %1893 = vmatpush1.bf16.msra.mxu1 %v2259_v43  ;;  %v2533_v43 = vld [vmem:[#allocation5 + $0x314] ss:$8 sps:$4 sm:$0xff]  }
  0x95   :  { %944 = vmatpush1.bf16.msra.mxu0 %v2438_v44  ;;  %v2495_v44 = vld [vmem:[#allocation5 + $0x250] ss:$8 sps:$4 sm:$0xff]  }
  0x96   :  { %945 = vmatprep.subr.bf16.mxu0 %v2443_v45  ;;  %v2268_v45 = vcombine.high %v1114_v41, %v1118_v42 }
  0x98   :  { %1894 = vmatprep.subr.bf16.mxu1 %v2268_v45  ;;  %v2536_v45 = vld [vmem:[#allocation5 + $0x324] ss:$8 sps:$4 sm:$0xff]  }
  0x99   :  { %946 = vmatpush1.bf16.msra.mxu0 %v2441_v46  ;;  %v2500_v46 = vld [vmem:[#allocation5 + $0x264] ss:$8 sps:$4 sm:$0xff]  }
  0x9a   :  { %947 = vmatprep.subr.bf16.mxu0 %v2446_v47  ;;  %v1122_v47 = vld [vmem:[#allocation8 + $0x180] sm:$0xff] }
  0x9d   :  { %948 = vmatpush1.bf16.msra.mxu0 %v2444_v48  ;;  %v1126_v48 = vld [vmem:[#allocation8 + $0x1a0] sm:$0xff] }
  0x9e   :  { %949 = vmatprep.subr.bf16.mxu0 %v2449_v49  ;;  %v2267_v49 = vcombine.low %v1114_v41, %v1118_v42  ;;  %v2528_v41 = vld [vmem:[#allocation5 + $0x300] ss:$8 sps:$4 sm:$0xff]  }
  0xa0   :  { %1895 = vmatpush1.bf16.msra.mxu1 %v2267_v49  ;;  %v2545_v49 = vld [vmem:[#allocation5 + $0x354] ss:$8 sps:$4 sm:$0xff]  }
  0xa1   :  { %950 = vmatpush1.bf16.msra.mxu0 %v2447_v50  ;;  %v2498_v50 = vld [vmem:[#allocation5 + $0x260] ss:$8 sps:$4 sm:$0xff]  }
  0xa2   :  { %951 = vmatprep.subr.bf16.mxu0 %v2452_v51  ;;  %v2276_v51 = vcombine.high %v1122_v47, %v1126_v48 }
  0xa4   :  { %1896 = vmatprep.subr.bf16.mxu1 %v2276_v51  ;;  %v2548_v51 = vld [vmem:[#allocation5 + $0x364] ss:$8 sps:$4 sm:$0xff]  }
  0xa5   :  { %952 = vmatpush1.bf16.msra.mxu0 %v2450_v52  ;;  %v2503_v52 = vld [vmem:[#allocation5 + $0x274] ss:$8 sps:$4 sm:$0xff]  }
  0xa6   :  { %953 = vmatprep.subr.bf16.mxu0 %v2455_v53  ;;  %v1130_v53 = vld [vmem:[#allocation8 + $0x1c0] sm:$0xff] }
  0xa9   :  { %954 = vmatpush1.bf16.msra.mxu0 %v2453_v54  ;;  %v1134_v54 = vld [vmem:[#allocation8 + $0x1e0] sm:$0xff] }
  0xaa   :  { %955 = vmatprep.subr.bf16.mxu0 %v2458_v55  ;;  %v2275_v55 = vcombine.low %v1122_v47, %v1126_v48  ;;  %v2539_v47 = vld [vmem:[#allocation5 + $0x334] ss:$8 sps:$4 sm:$0xff]   ;;  %v2537_v48 = vld [vmem:[#allocation5 + $0x330] ss:$8 sps:$4 sm:$0xff]  }
  0xac   :  { %1897 = vmatpush1.bf16.msra.mxu1 %v2275_v55  ;;  %v2554_v55 = vld [vmem:[#allocation5 + $0x384] ss:$8 sps:$4 sm:$0xff]  }
  0xad   :  { %956 = vmatpush1.bf16.msra.mxu0 %v2456_v56  ;;  %v2501_v56 = vld [vmem:[#allocation5 + $0x270] ss:$8 sps:$4 sm:$0xff]  }
  0xae   :  { %957 = vmatprep.subr.bf16.mxu0 %v2461_v57  ;;  %v2284_v57 = vcombine.high %v1130_v53, %v1134_v54 }
  0xb0   :  { %1898 = vmatprep.subr.bf16.mxu1 %v2284_v57  ;;  %v2557_v57 = vld [vmem:[#allocation5 + $0x394] ss:$8 sps:$4 sm:$0xff]  }
  0xb1   :  { %958 = vmatpush1.bf16.msra.mxu0 %v2459_v58  ;;  %v2506_v58 = vld [vmem:[#allocation5 + $0x284] ss:$8 sps:$4 sm:$0xff]  }
  0xb2   :  { %959 = vmatprep.subr.bf16.mxu0 %v2464_v59  ;;  %v1138_v59 = vld [vmem:[#allocation8 + $0x200] sm:$0xff] }
  0xb5   :  { %960 = vmatpush1.bf16.msra.mxu0 %v2462_v60  ;;  %v1142_v60 = vld [vmem:[#allocation8 + $0x220] sm:$0xff] }
  0xb6   :  { %961 = vmatprep.subr.bf16.mxu0 %v2467_v61  ;;  %v2283_v61 = vcombine.low %v1130_v53, %v1134_v54  ;;  %v2551_v53 = vld [vmem:[#allocation5 + $0x374] ss:$8 sps:$4 sm:$0xff]   ;;  %v2549_v54 = vld [vmem:[#allocation5 + $0x370] ss:$8 sps:$4 sm:$0xff]  }
  0xb8   :  { %1899 = vmatpush1.bf16.msra.mxu1 %v2283_v61  ;;  %v2563_v61 = vld [vmem:[#allocation5 + $0x3b4] ss:$8 sps:$4 sm:$0xff]  }
  0xb9   :  { %962 = vmatpush1.bf16.msra.mxu0 %v2465_v62  ;;  %v2504_v62 = vld [vmem:[#allocation5 + $0x280] ss:$8 sps:$4 sm:$0xff]  }
  0xba   :  { %963 = vmatprep.subr.bf16.mxu0 %v2470_v63  ;;  %v2292_v63 = vcombine.high %v1138_v59, %v1142_v60 }
  0xbc   :  { %1900 = vmatprep.subr.bf16.mxu1 %v2292_v63  ;;  %v2566_v63 = vld [vmem:[#allocation5 + $0x3c4] ss:$8 sps:$4 sm:$0xff]  }
  0xbd   :  { %964 = vmatpush1.bf16.msra.mxu0 %v2468_v0  ;;  %v2509_v0 = vld [vmem:[#allocation5 + $0x294] ss:$8 sps:$4 sm:$0xff]  }
  0xbe   :  { %965 = vmatprep.subr.bf16.mxu0 %v2473_v1  ;;  %v1146_v1 = vld [vmem:[#allocation8 + $0x240] sm:$0xff] }
  0xc1   :  { %966 = vmatpush1.bf16.msra.mxu0 %v2471_v2  ;;  %v1150_v2 = vld [vmem:[#allocation8 + $0x260] sm:$0xff] }
  0xc2   :  { %967 = vmatprep.subr.bf16.mxu0 %v2476_v3  ;;  %v2291_v3 = vcombine.low %v1138_v59, %v1142_v60  ;;  %v2560_v59 = vld [vmem:[#allocation5 + $0x3a4] ss:$8 sps:$4 sm:$0xff]   ;;  %v2558_v60 = vld [vmem:[#allocation5 + $0x3a0] ss:$8 sps:$4 sm:$0xff]  }
  0xc4   :  { %1901 = vmatpush1.bf16.msra.mxu1 %v2291_v3  ;;  %v2572_v3 = vld [vmem:[#allocation5 + $0x3e4] ss:$8 sps:$4 sm:$0xff]  }
  0xc5   :  { %968 = vmatpush1.bf16.msra.mxu0 %v2474_v4  ;;  %v2507_v4 = vld [vmem:[#allocation5 + $0x290] ss:$8 sps:$4 sm:$0xff]  }
  0xc6   :  { %969 = vmatprep.subr.bf16.mxu0 %v2479_v5  ;;  %v2300_v5 = vcombine.high %v1146_v1, %v1150_v2 }
  0xc8   :  { %1902 = vmatprep.subr.bf16.mxu1 %v2300_v5  ;;  %v2575_v5 = vld [vmem:[#allocation5 + $0x3f4] ss:$8 sps:$4 sm:$0xff]  }
  0xc9   :  { %970 = vmatpush1.bf16.msra.mxu0 %v2477_v6  ;;  %v2512_v6 = vld [vmem:[#allocation5 + $0x2a4] ss:$8 sps:$4 sm:$0xff]  }
  0xca   :  { %982 = vmatprep.subr.bf16.mxu0 %v2482_v7  ;;  %v1154_v7 = vld [vmem:[#allocation8 + $0x280] sm:$0xff] }
  0xcc   :  { %972 = vmatmul.mubr.bf16.vlgmr.msra.gmra.mrb[0].mxu0 %v2093_v10  ;;  %v1158_v10 = vld [vmem:[#allocation8 + $0x2a0] sm:$0xff] }
  0xcd   :  { %983 = vmatpush1.bf16.msra.mxu0 %v2480_v11  ;;  %1014 = vmatprep.mubr.bf16.mxu0 %v2096_v12  ;;  %v2299_v11 = vcombine.low %v1146_v1, %v1150_v2  ;;  %v2510_v12 = vld [vmem:[#allocation5 + $0x2a0] ss:$8 sps:$4 sm:$0xff]   ;;  %v2569_v1 = vld [vmem:[#allocation5 + $0x3d4] ss:$8 sps:$4 sm:$0xff]   ;;  %v2567_v2 = vld [vmem:[#allocation5 + $0x3d0] ss:$8 sps:$4 sm:$0xff]  }
  0xce   :  { %984 = vmatprep.subr.bf16.mxu0 %v2485_v13  ;;  %v2308_v13 = vcombine.high %v1154_v7, %v1158_v10 }
  0xcf   :  { %1903 = vmatpush1.bf16.msra.mxu1 %v2299_v11  ;;  %v1190_v11 = vld [vmem:[#allocation8 + $0x3a0] sm:$0xff] }
  0xd0   :  { %1904 = vmatprep.subr.bf16.mxu1 %v2308_v13 }
  0xd1   :  { %985 = vmatpush1.bf16.msra.mxu0 %v2483_v17  ;;  %v2307_v17 = vcombine.low %v1154_v7, %v1158_v10  ;;  %v1186_v10 = vld [vmem:[#allocation8 + $0x380] sm:$0xff] }
  0xd2   :  { %986 = vmatprep.subr.bf16.mxu0 %v2488_v21  ;;  %v1170_v21 = vld [vmem:[#allocation8 + $0x300] sm:$0xff]  ;;  %v2339_v13 = vcombine.low %v1186_v10, %v1190_v11 }
  0xd3   :  { %1905 = vmatpush1.bf16.msra.mxu1 %v2307_v17  ;;  %v2324_v25 = vcombine.high %v1170_v21, %v1174_v22  ;;  %v2323_v29 = vcombine.low %v1170_v21, %v1174_v22  ;;  %v212_v22 = vld [vmem:[#allocation7] sm:$0xff] }
  0xd4   :  { %1906 = vmatprep.subr.bf16.mxu1 %v2316_v19  ;;  %v1079_v19 = vld [vmem:[#allocation8 + $0x28] sm:$0xff] }
  0xd5   :  { %987 = vmatpush1.bf16.msra.mxu0 %v2486_v26  ;;  %v2521_v26 = vld [vmem:[#allocation5 + $0x2d4] ss:$8 sps:$4 sm:$0xff]  }
  0xd6   :  { %988 = vmatprep.subr.bf16.mxu0 %v2491_v28  ;;  %v1182_v28 = vld [vmem:[#allocation8 + $0x360] sm:$0xff] }
  0xd7   :  { %1907 = vmatpush1.bf16.msra.mxu1 %v2315_v23  ;;  %v2332_v31 = vcombine.high %v1178_v27, %v1182_v28  ;;  %v2331_v33 = vcombine.low %v1178_v27, %v1182_v28  ;;  %v213_v23 = vld [vmem:[#allocation7 + $0x8] sm:$0xff]  ;;  %v215_v28 = vld [vmem:[#allocation7 + $0x18] sm:$0xff] }
  0xd8   :  { %1908 = vmatprep.subr.bf16.mxu1 %v2324_v25  ;;  %v214_v25 = vld [vmem:[#allocation7 + $0x10] sm:$0xff] }
  0xd9   :  { %989 = vmatpush1.bf16.msra.mxu0 %v2489_v32  ;;  %v2524_v32 = vld [vmem:[#allocation5 + $0x2e4] ss:$8 sps:$4 sm:$0xff]  }
  0xda   :  { %990 = vmatprep.subr.bf16.mxu0 %v2494_v34  ;;  %v2522_v34 = vld [vmem:[#allocation5 + $0x2e0] ss:$8 sps:$4 sm:$0xff]  }
  0xdb   :  { %1909 = vmatpush1.bf16.msra.mxu1 %v2323_v29 }
  0xdc   :  { %1910 = vmatprep.subr.bf16.mxu1 %v2332_v31 }
  0xdd   :  { %991 = vmatpush1.bf16.msra.mxu0 %v2492_v38  ;;  %v2805_v38 = vld [vmem:[#allocation2 + $0x18] sm:$0xff] }
  0xde   :  { %992 = vmatprep.subr.bf16.mxu0 %v2497_v40  ;;  %v2095_v40 = vcombine.low %v2797_v8, %v2799_v9  ;;  %v2098_v42 = vcombine.high %v2805_v38, %v2807_v39  ;;  %v2542_v8 = vld [vmem:[#allocation5 + $0x344] ss:$8 sps:$4 sm:$0xff]   ;;  %v2540_v9 = vld [vmem:[#allocation5 + $0x340] ss:$8 sps:$4 sm:$0xff]   ;;  %v2097_v7 = vcombine.low %v2805_v38, %v2807_v39 }
  0xdf   :  { %1911 = vmatpush1.bf16.msra.mxu1 %v2331_v33  ;;  %v1083_v38 = vld [vmem:[#allocation8 + $0x48] sm:$0xff] }
  0xe0   :  { %v1087_v39 = vld [vmem:[#allocation8 + $0x68] sm:$0xff] }
  0xe1   :  { %993 = vmatpush1.bf16.msra.mxu0 %v2495_v44  ;;  %v2531_v44 = vld [vmem:[#allocation5 + $0x310] ss:$8 sps:$4 sm:$0xff]  }
  0xe2   :  { %994 = vmatprep.subr.bf16.mxu0 %v2500_v46  ;;  %v2534_v46 = vld [vmem:[#allocation5 + $0x320] ss:$8 sps:$4 sm:$0xff]  }
  0xe5   :  { %995 = vmatpush1.bf16.msra.mxu0 %v2498_v50  ;;  %v2543_v50 = vld [vmem:[#allocation5 + $0x350] ss:$8 sps:$4 sm:$0xff]  }
  0xe6   :  { %996 = vmatprep.subr.bf16.mxu0 %v2503_v52  ;;  %v2546_v52 = vld [vmem:[#allocation5 + $0x360] ss:$8 sps:$4 sm:$0xff]  }
  0xe9   :  { %997 = vmatpush1.bf16.msra.mxu0 %v2501_v56  ;;  %v2552_v56 = vld [vmem:[#allocation5 + $0x380] ss:$8 sps:$4 sm:$0xff]  }
  0xea   :  { %998 = vmatprep.subr.bf16.mxu0 %v2506_v58  ;;  %v2555_v58 = vld [vmem:[#allocation5 + $0x390] ss:$8 sps:$4 sm:$0xff]  }
  0xed   :  { %999 = vmatpush1.bf16.msra.mxu0 %v2504_v62  ;;  %v2561_v62 = vld [vmem:[#allocation5 + $0x3b0] ss:$8 sps:$4 sm:$0xff]  }
  0xee   :  { %1000 = vmatprep.subr.bf16.mxu0 %v2509_v0  ;;  %v2564_v0 = vld [vmem:[#allocation5 + $0x3c0] ss:$8 sps:$4 sm:$0xff]  }
  0xf1   :  { %1001 = vmatpush1.bf16.msra.mxu0 %v2507_v4  ;;  %v2570_v4 = vld [vmem:[#allocation5 + $0x3e0] ss:$8 sps:$4 sm:$0xff]  }
  0xf2   :  { %1002 = vmatprep.subr.bf16.mxu0 %v2512_v6  ;;  %v2573_v6 = vld [vmem:[#allocation5 + $0x3f0] ss:$8 sps:$4 sm:$0xff]  }
  0xf5   :  { %1003 = vmatpush1.bf16.msra.mxu0 %v2510_v12  ;;  %v2340_v12 = vcombine.high %v1186_v10, %v1190_v11  ;;  %v1155_v11 = vld [vmem:[#allocation8 + $0x288] sm:$0xff] }
  0xf6   :  { %1004 = vmatprep.subr.bf16.mxu0 %v2515_v14  ;;  %v1194_v14 = vld [vmem:[#allocation8 + $0x3c0] sm:$0xff] }
  0xf7   :  { %1912 = vmatprep.subr.bf16.mxu1 %v2340_v12  ;;  %v2348_v16 = vcombine.high %v1194_v14, %v1198_v15  ;;  %v2347_v17 = vcombine.low %v1194_v14, %v1198_v15  ;;  %v1159_v12 = vld [vmem:[#allocation8 + $0x2a8] sm:$0xff] }
  0xf8   :  { %1913 = vmatpush1.bf16.msra.mxu1 %v2339_v13  ;;  %v2310_v14 = vcombine.high %v1155_v11, %v1159_v12  ;;  %v1163_v15 = vld [vmem:[#allocation8 + $0x2c8] sm:$0xff] }
  0xf9   :  { %1005 = vmatpush1.bf16.msra.mxu0 %v2513_v18  ;;  %1914 = vmatprep.subr.bf16.mxu1 %v2348_v16  ;;  %v1075_v18 = vld [vmem:[#allocation8 + $0x8] sm:$0xff] }
  0xfa   :  { %1006 = vmatprep.subr.bf16.mxu0 %v2518_v20  ;;  %v2230_v20 = vcombine.high %v1075_v18, %v1079_v19  ;;  %v2229_v21 = vcombine.low %v1075_v18, %v1079_v19  ;;  %v1167_v16 = vld [vmem:[#allocation8 + $0x2e8] sm:$0xff] }
  0xfb   :  { %v2318_v18 = vcombine.high %v1163_v15, %v1167_v16  ;;  %v1171_v19 = vld [vmem:[#allocation8 + $0x308] sm:$0xff] }
  0xfc   :  { %1915 = vmatpush1.bf16.msra.mxu1 %v2347_v17  ;;  %v2309_v17 = vcombine.low %v1155_v11, %v1159_v12 }
  0xfd   :  { %1007 = vmatpush1.bf16.msra.mxu0 %v2516_v24  ;;  %1927 = vmatprep.subr.bf16.mxu1 %v2230_v20  ;;  %v1175_v20 = vld [vmem:[#allocation8 + $0x328] sm:$0xff] }
  0xfe   :  { %1008 = vmatprep.subr.bf16.mxu0 %v2521_v26 }
 0x101   :  { %1009 = vmatpush1.bf16.msra.mxu0 %v2519_v30 }
 0x102   :  { %1010 = vmatprep.subr.bf16.mxu0 %v2524_v32 }
 0x105   :  { %1011 = vmatpush1.bf16.msra.mxu0 %v2522_v34 }
 0x106   :  { %1012 = vmatprep.subr.bf16.mxu0 %v2527_v35 }
 0x109   :  { %1013 = vmatpush1.bf16.msra.mxu0 %v2525_v36 }
 0x10a   :  { %1025 = vmatprep.subr.bf16.mxu0 %v2530_v37 }
 0x10c   :  { %1015 = vmatmul.mubr.bf16.vlgmr.msra.gmra.mrb[0].mxu0 %v2095_v40 }
 0x10d   :  { %1026 = vmatpush1.bf16.msra.mxu0 %v2528_v41  ;;  %1057 = vmatprep.mubr.bf16.mxu0 %v2098_v42  ;;  %v2238_v42 = vcombine.high %v1083_v38, %v1087_v39 }
 0x10e   :  { %1027 = vmatprep.subr.bf16.mxu0 %v2533_v43  ;;  %v1091_v43 = vld [vmem:[#allocation8 + $0x88] sm:$0xff] }
 0x111   :  { %1028 = vmatpush1.bf16.msra.mxu0 %v2531_v44  ;;  %v1095_v44 = vld [vmem:[#allocation8 + $0xa8] sm:$0xff] }
 0x112   :  { %1029 = vmatprep.subr.bf16.mxu0 %v2536_v45  ;;  %v2237_v45 = vcombine.low %v1083_v38, %v1087_v39  ;;  %v1084_v39 = vld [vmem:[#allocation8 + $0x50] sm:$0xff] }
 0x115   :  { %1030 = vmatpush1.bf16.msra.mxu0 %v2534_v46  ;;  %v2246_v46 = vcombine.high %v1091_v43, %v1095_v44 }
 0x116   :  { %1031 = vmatprep.subr.bf16.mxu0 %v2539_v47  ;;  %v1099_v47 = vld [vmem:[#allocation8 + $0xc8] sm:$0xff] }
 0x119   :  { %1032 = vmatpush1.bf16.msra.mxu0 %v2537_v48  ;;  %v1103_v48 = vld [vmem:[#allocation8 + $0xe8] sm:$0xff] }
 0x11a   :  { %1033 = vmatprep.subr.bf16.mxu0 %v2542_v8  ;;  %v2245_v8 = vcombine.low %v1091_v43, %v1095_v44 }
 0x11d   :  { %1034 = vmatpush1.bf16.msra.mxu0 %v2540_v9  ;;  %v2254_v9 = vcombine.high %v1099_v47, %v1103_v48 }
 0x11e   :  { %1035 = vmatprep.subr.bf16.mxu0 %v2545_v49  ;;  %v1107_v49 = vld [vmem:[#allocation8 + $0x108] sm:$0xff] }
 0x121   :  { %1036 = vmatpush1.bf16.msra.mxu0 %v2543_v50  ;;  %v1111_v50 = vld [vmem:[#allocation8 + $0x128] sm:$0xff] }
 0x122   :  { %1037 = vmatprep.subr.bf16.mxu0 %v2548_v51  ;;  %v2253_v51 = vcombine.low %v1099_v47, %v1103_v48 }
 0x125   :  { %1038 = vmatpush1.bf16.msra.mxu0 %v2546_v52  ;;  %v2262_v52 = vcombine.high %v1107_v49, %v1111_v50 }
 0x126   :  { %1039 = vmatprep.subr.bf16.mxu0 %v2551_v53  ;;  %v1115_v53 = vld [vmem:[#allocation8 + $0x148] sm:$0xff] }
 0x129   :  { %1040 = vmatpush1.bf16.msra.mxu0 %v2549_v54  ;;  %v1119_v54 = vld [vmem:[#allocation8 + $0x168] sm:$0xff] }
 0x12a   :  { %1041 = vmatprep.subr.bf16.mxu0 %v2554_v55  ;;  %v2261_v55 = vcombine.low %v1107_v49, %v1111_v50 }
 0x12d   :  { %1042 = vmatpush1.bf16.msra.mxu0 %v2552_v56  ;;  %v2270_v56 = vcombine.high %v1115_v53, %v1119_v54 }
 0x12e   :  { %1043 = vmatprep.subr.bf16.mxu0 %v2557_v57  ;;  %v1123_v57 = vld [vmem:[#allocation8 + $0x188] sm:$0xff] }
 0x131   :  { %1044 = vmatpush1.bf16.msra.mxu0 %v2555_v58  ;;  %v1127_v58 = vld [vmem:[#allocation8 + $0x1a8] sm:$0xff] }
 0x132   :  { %1045 = vmatprep.subr.bf16.mxu0 %v2560_v59  ;;  %v2269_v59 = vcombine.low %v1115_v53, %v1119_v54 }
 0x135   :  { %1046 = vmatpush1.bf16.msra.mxu0 %v2558_v60  ;;  %v2278_v60 = vcombine.high %v1123_v57, %v1127_v58 }
 0x136   :  { %1047 = vmatprep.subr.bf16.mxu0 %v2563_v61  ;;  %v1131_v61 = vld [vmem:[#allocation8 + $0x1c8] sm:$0xff] }
 0x139   :  { %1048 = vmatpush1.bf16.msra.mxu0 %v2561_v62  ;;  %v1135_v62 = vld [vmem:[#allocation8 + $0x1e8] sm:$0xff] }
 0x13a   :  { %1049 = vmatprep.subr.bf16.mxu0 %v2566_v63  ;;  %v2277_v63 = vcombine.low %v1123_v57, %v1127_v58 }
 0x13d   :  { %1050 = vmatpush1.bf16.msra.mxu0 %v2564_v0  ;;  %v2286_v0 = vcombine.high %v1131_v61, %v1135_v62 }
 0x13e   :  { %1051 = vmatprep.subr.bf16.mxu0 %v2569_v1  ;;  %v1139_v1 = vld [vmem:[#allocation8 + $0x208] sm:$0xff] }
 0x141   :  { %1052 = vmatpush1.bf16.msra.mxu0 %v2567_v2  ;;  %v1143_v2 = vld [vmem:[#allocation8 + $0x228] sm:$0xff] }
 0x142   :  { %1053 = vmatprep.subr.bf16.mxu0 %v2572_v3  ;;  %v2285_v3 = vcombine.low %v1131_v61, %v1135_v62 }
 0x145   :  { %1054 = vmatpush1.bf16.msra.mxu0 %v2570_v4  ;;  %v2294_v4 = vcombine.high %v1139_v1, %v1143_v2 }
 0x146   :  { %1055 = vmatprep.subr.bf16.mxu0 %v2575_v5  ;;  %v1147_v5 = vld [vmem:[#allocation8 + $0x248] sm:$0xff] }
 0x149   :  { %1056 = vmatpush1.bf16.msra.mxu0 %v2573_v6  ;;  %v1151_v6 = vld [vmem:[#allocation8 + $0x268] sm:$0xff] }
 0x14a   :  { %v2302_v10 = vcombine.high %v1147_v5, %v1151_v6  ;;  %v2301_v13 = vcombine.low %v1147_v5, %v1151_v6 }
 0x14c   :  { %1058 = vmatmul.mubr.bf16.vlgmr.msra.gmra.mrb[0].mxu0 %v2097_v7  ;;  %v2293_v7 = vcombine.low %v1139_v1, %v1143_v2 }
 0x21f   :  { %v1059_v24 = vpop.f32.mrb[0].mxu0 }
 0x220   :  { %v2355_v26 = vadd.f32 %v1059_v24, %v212_v22  ;;  %v1061_v27 = vpop.f32.mrb[1].mxu0  ;;  %v2326_v22 = vcombine.high %v1171_v19, %v1175_v20  ;;  %v1183_v24 = vld [vmem:[#allocation8 + $0x368] sm:$0xff] }
 0x221   :  { %v2356_v29 = vadd.f32 %v1061_v27, %v213_v23  ;;  %v1063_v30 = vpop.f32.mrb[2].mxu0  ;;  %v1179_v23 = vld [vmem:[#allocation8 + $0x348] sm:$0xff] }
 0x222   :  { %v2357_v31 = vadd.f32 %v1063_v30, %v214_v25  ;;  %v1065_v32 = vpop.f32.mrb[3].mxu0  ;;  %v1068_v34 = vmax.f32 %v2355_v26, 0.0  ;;  %v2325_v25 = vcombine.low %v1171_v19, %v1175_v20  ;;  %v2334_v26 = vcombine.high %v1179_v23, %v1183_v24  ;;  %v1187_v27 = vld [vmem:[#allocation8 + $0x388] sm:$0xff] }
 0x223   :  { %v2358_v33 = vadd.f32 %v1065_v32, %v215_v28  ;;  %v1069_v36 = vmax.f32 %v2356_v29, 0.0  ;;  %v1191_v28 = vld [vmem:[#allocation8 + $0x3a8] sm:$0xff]  ;;  %v2333_v29 = vcombine.low %v1179_v23, %v1183_v24 }
 0x224   :  { %v1070_v35 = vmax.f32 %v2357_v31, 0.0  ;;  %v2342_v30 = vcombine.high %v1187_v27, %v1191_v28  ;;  %v1195_v31 = vld [vmem:[#allocation8 + $0x3c8] sm:$0xff] }
 0x225   :  { %v1071_v37 = vmax.f32 %v2358_v33, 0.0  ;;  %v1199_v32 = vld [vmem:[#allocation8 + $0x3e8] sm:$0xff]  ;;  %v2341_v33 = vcombine.low %v1187_v27, %v1191_v28 }
 0x226   :  { %v2815_v40 = vpack.c.bf16 %v1070_v35, %v1068_v34  ;;  %v2350_v34 = vcombine.high %v1195_v31, %v1199_v32  ;;  %v1076_v35 = vld [vmem:[#allocation8 + $0x10] sm:$0xff] }
 0x227   :  { %v2817_v41 = vpack.c.bf16 %v1071_v37, %v1069_v36  ;;  %v1080_v36 = vld [vmem:[#allocation8 + $0x30] sm:$0xff]  ;;  %v2349_v37 = vcombine.low %v1195_v31, %v1199_v32 }
 0x228   :  { %v2232_v38 = vcombine.high %v1076_v35, %v1080_v36  ;;  %v2231_v43 = vcombine.low %v1076_v35, %v1080_v36 }
 0x229   :  { %1916 = vmatprep.mubr.bf16.mxu1 %v2817_v41 }
 0x22a   :  { %1917 = vmatmul.mubr.bf16.vlgmr.msra.gmra.mrb[0].mxu1 %v2815_v40 }
 0x22b   :  { %1928 = vmatpush1.bf16.msra.mxu1 %v2229_v21  ;;  %1959 = vmatprep.mubr.bf16.mxu1 %v2817_v41  ;;  %v2317_v21 = vcombine.low %v1163_v15, %v1167_v16 }
 0x22c   :  { %1929 = vmatprep.subr.bf16.mxu1 %v2238_v42  ;;  %v1088_v42 = vld [vmem:[#allocation8 + $0x70] sm:$0xff] }
 0x22d   :  { %v2240_v44 = vcombine.high %v1084_v39, %v1088_v42  ;;  %v2239_v47 = vcombine.low %v1084_v39, %v1088_v42 }
 0x22f   :  { %1930 = vmatpush1.bf16.msra.mxu1 %v2237_v45  ;;  %v1092_v45 = vld [vmem:[#allocation8 + $0x90] sm:$0xff] }
 0x230   :  { %1931 = vmatprep.subr.bf16.mxu1 %v2246_v46  ;;  %v1096_v46 = vld [vmem:[#allocation8 + $0xb0] sm:$0xff] }
 0x231   :  { %v2248_v48 = vcombine.high %v1092_v45, %v1096_v46  ;;  %v2247_v49 = vcombine.low %v1092_v45, %v1096_v46 }
 0x233   :  { %1932 = vmatpush1.bf16.msra.mxu1 %v2245_v8  ;;  %v1100_v8 = vld [vmem:[#allocation8 + $0xd0] sm:$0xff] }
 0x234   :  { %1933 = vmatprep.subr.bf16.mxu1 %v2254_v9  ;;  %v1104_v9 = vld [vmem:[#allocation8 + $0xf0] sm:$0xff] }
 0x235   :  { %v2256_v50 = vcombine.high %v1100_v8, %v1104_v9  ;;  %v2255_v53 = vcombine.low %v1100_v8, %v1104_v9 }
 0x237   :  { %1934 = vmatpush1.bf16.msra.mxu1 %v2253_v51  ;;  %v1108_v51 = vld [vmem:[#allocation8 + $0x110] sm:$0xff] }
 0x238   :  { %1935 = vmatprep.subr.bf16.mxu1 %v2262_v52  ;;  %v1112_v52 = vld [vmem:[#allocation8 + $0x130] sm:$0xff] }
 0x239   :  { %v2264_v54 = vcombine.high %v1108_v51, %v1112_v52  ;;  %v2263_v57 = vcombine.low %v1108_v51, %v1112_v52 }
 0x23b   :  { %1936 = vmatpush1.bf16.msra.mxu1 %v2261_v55  ;;  %v1116_v55 = vld [vmem:[#allocation8 + $0x150] sm:$0xff] }
 0x23c   :  { %1937 = vmatprep.subr.bf16.mxu1 %v2270_v56  ;;  %v1120_v56 = vld [vmem:[#allocation8 + $0x170] sm:$0xff] }
 0x23d   :  { %v2272_v58 = vcombine.high %v1116_v55, %v1120_v56  ;;  %v2271_v61 = vcombine.low %v1116_v55, %v1120_v56 }
 0x23f   :  { %1938 = vmatpush1.bf16.msra.mxu1 %v2269_v59  ;;  %v1124_v59 = vld [vmem:[#allocation8 + $0x190] sm:$0xff] }
 0x240   :  { %1939 = vmatprep.subr.bf16.mxu1 %v2278_v60  ;;  %v1128_v60 = vld [vmem:[#allocation8 + $0x1b0] sm:$0xff] }
 0x241   :  { %v2280_v62 = vcombine.high %v1124_v59, %v1128_v60  ;;  %v2279_v1 = vcombine.low %v1124_v59, %v1128_v60  ;;  %v1125_v60 = vld [vmem:[#allocation8 + $0x198] sm:$0xff] }
 0x243   :  { %1940 = vmatpush1.bf16.msra.mxu1 %v2277_v63  ;;  %v1132_v63 = vld [vmem:[#allocation8 + $0x1d0] sm:$0xff] }
 0x244   :  { %1941 = vmatprep.subr.bf16.mxu1 %v2286_v0  ;;  %v1136_v0 = vld [vmem:[#allocation8 + $0x1f0] sm:$0xff] }
 0x245   :  { %v2288_v2 = vcombine.high %v1132_v63, %v1136_v0  ;;  %v2287_v5 = vcombine.low %v1132_v63, %v1136_v0  ;;  %v1133_v0 = vld [vmem:[#allocation8 + $0x1d8] sm:$0xff] }
 0x247   :  { %1942 = vmatpush1.bf16.msra.mxu1 %v2285_v3  ;;  %v1140_v3 = vld [vmem:[#allocation8 + $0x210] sm:$0xff] }
 0x248   :  { %1943 = vmatprep.subr.bf16.mxu1 %v2294_v4  ;;  %v1144_v4 = vld [vmem:[#allocation8 + $0x230] sm:$0xff] }
 0x249   :  { %v2296_v6 = vcombine.high %v1140_v3, %v1144_v4  ;;  %v2295_v11 = vcombine.low %v1140_v3, %v1144_v4  ;;  %v1141_v4 = vld [vmem:[#allocation8 + $0x218] sm:$0xff] }
 0x24b   :  { %1944 = vmatpush1.bf16.msra.mxu1 %v2293_v7  ;;  %v1148_v7 = vld [vmem:[#allocation8 + $0x250] sm:$0xff] }
 0x24c   :  { %1945 = vmatprep.subr.bf16.mxu1 %v2302_v10  ;;  %v1152_v10 = vld [vmem:[#allocation8 + $0x270] sm:$0xff] }
 0x24d   :  { %v2304_v12 = vcombine.high %v1148_v7, %v1152_v10  ;;  %v2303_v15 = vcombine.low %v1148_v7, %v1152_v10  ;;  %v1149_v10 = vld [vmem:[#allocation8 + $0x258] sm:$0xff] }
 0x24f   :  { %1946 = vmatpush1.bf16.msra.mxu1 %v2301_v13  ;;  %v1156_v13 = vld [vmem:[#allocation8 + $0x290] sm:$0xff] }
 0x250   :  { %1947 = vmatprep.subr.bf16.mxu1 %v2310_v14  ;;  %v1160_v14 = vld [vmem:[#allocation8 + $0x2b0] sm:$0xff] }
 0x251   :  { %v2312_v16 = vcombine.high %v1156_v13, %v1160_v14  ;;  %v2311_v19 = vcombine.low %v1156_v13, %v1160_v14  ;;  %v1157_v14 = vld [vmem:[#allocation8 + $0x298] sm:$0xff] }
 0x253   :  { %1948 = vmatpush1.bf16.msra.mxu1 %v2309_v17  ;;  %v1164_v17 = vld [vmem:[#allocation8 + $0x2d0] sm:$0xff] }
 0x254   :  { %1949 = vmatprep.subr.bf16.mxu1 %v2318_v18  ;;  %v1168_v18 = vld [vmem:[#allocation8 + $0x2f0] sm:$0xff] }
 0x255   :  { %v2320_v20 = vcombine.high %v1164_v17, %v1168_v18  ;;  %v2319_v23 = vcombine.low %v1164_v17, %v1168_v18  ;;  %v1165_v18 = vld [vmem:[#allocation8 + $0x2d8] sm:$0xff] }
 0x257   :  { %1950 = vmatpush1.bf16.msra.mxu1 %v2317_v21  ;;  %v1172_v21 = vld [vmem:[#allocation8 + $0x310] sm:$0xff] }
 0x258   :  { %1951 = vmatprep.subr.bf16.mxu1 %v2326_v22  ;;  %v1176_v22 = vld [vmem:[#allocation8 + $0x330] sm:$0xff] }
 0x259   :  { %v2328_v24 = vcombine.high %v1172_v21, %v1176_v22  ;;  %v2327_v27 = vcombine.low %v1172_v21, %v1176_v22  ;;  %v1173_v22 = vld [vmem:[#allocation8 + $0x318] sm:$0xff] }
 0x25b   :  { %1952 = vmatpush1.bf16.msra.mxu1 %v2325_v25  ;;  %v1180_v25 = vld [vmem:[#allocation8 + $0x350] sm:$0xff] }
 0x25c   :  { %1953 = vmatprep.subr.bf16.mxu1 %v2334_v26  ;;  %v1184_v26 = vld [vmem:[#allocation8 + $0x370] sm:$0xff] }
 0x25d   :  { %v2336_v28 = vcombine.high %v1180_v25, %v1184_v26  ;;  %v2335_v31 = vcombine.low %v1180_v25, %v1184_v26  ;;  %v1181_v26 = vld [vmem:[#allocation8 + $0x358] sm:$0xff] }
 0x25f   :  { %1954 = vmatpush1.bf16.msra.mxu1 %v2333_v29  ;;  %v1188_v29 = vld [vmem:[#allocation8 + $0x390] sm:$0xff] }
 0x260   :  { %1955 = vmatprep.subr.bf16.mxu1 %v2342_v30  ;;  %v1192_v30 = vld [vmem:[#allocation8 + $0x3b0] sm:$0xff] }
 0x261   :  { %v2344_v32 = vcombine.high %v1188_v29, %v1192_v30  ;;  %v2343_v35 = vcombine.low %v1188_v29, %v1192_v30  ;;  %v1189_v30 = vld [vmem:[#allocation8 + $0x398] sm:$0xff] }
 0x263   :  { %1956 = vmatpush1.bf16.msra.mxu1 %v2341_v33  ;;  %v1196_v33 = vld [vmem:[#allocation8 + $0x3d0] sm:$0xff] }
 0x264   :  { %1957 = vmatprep.subr.bf16.mxu1 %v2350_v34  ;;  %v1200_v34 = vld [vmem:[#allocation8 + $0x3f0] sm:$0xff] }
 0x265   :  { %v2352_v36 = vcombine.high %v1196_v33, %v1200_v34  ;;  %v2351_v39 = vcombine.low %v1196_v33, %v1200_v34  ;;  %v1197_v34 = vld [vmem:[#allocation8 + $0x3d8] sm:$0xff] }
 0x267   :  { %1958 = vmatpush1.bf16.msra.mxu1 %v2349_v37  ;;  %v1077_v37 = vld [vmem:[#allocation8 + $0x18] sm:$0xff] }
 0x268   :  { %1970 = vmatprep.subr.bf16.mxu1 %v2232_v38  ;;  %v1081_v38 = vld [vmem:[#allocation8 + $0x38] sm:$0xff] }
 0x269   :  { %v2234_v42 = vcombine.high %v1077_v37, %v1081_v38  ;;  %v2233_v45 = vcombine.low %v1077_v37, %v1081_v38 }
 0x26a   :  { %1960 = vmatmul.mubr.bf16.vlgmr.msra.gmra.mrb[4].mxu1 %v2815_v40 }
 0x26b   :  { %1971 = vmatpush1.bf16.msra.mxu1 %v2231_v43  ;;  %2002 = vmatprep.mubr.bf16.mxu1 %v2817_v41  ;;  %v1085_v43 = vld [vmem:[#allocation8 + $0x58] sm:$0xff] }
 0x26c   :  { %1972 = vmatprep.subr.bf16.mxu1 %v2240_v44  ;;  %v1089_v44 = vld [vmem:[#allocation8 + $0x78] sm:$0xff] }
 0x26d   :  { %v2242_v46 = vcombine.high %v1085_v43, %v1089_v44  ;;  %v2241_v8 = vcombine.low %v1085_v43, %v1089_v44  ;;  %v1202_v44 = vld [vmem:[%s2846_s4] sm:$0xff]  ;;  %s2704_s4 = smov [#allocation10]  }
 0x26e   :  { %s2077_s17 = sshll.u32 %s2704_s4, 4  ;;  %s2078_s17 = int_to_ptr.vmem [resolvable:$true] %s2077_s17 }
 0x26f   :  { %1973 = vmatpush1.bf16.msra.mxu1 %v2239_v47  ;;  %v1093_v47 = vld [vmem:[#allocation8 + $0x98] sm:$0xff]  ;;  %s2664_s20 = scalar_lea.vmem %s2078_s17, 2048  ;;  %p2669_p5 = scmp.lt.s32.totalorder %s2078_s17, %s2078_s17 }
 0x270   :  { %1974 = vmatprep.subr.bf16.mxu1 %v2248_v48  ;;  %v1097_v48 = vld [vmem:[#allocation8 + $0xb8] sm:$0xff]  ;;  %p2665_p4 = scmp.ne.s32.totalorder %s2078_s17, %s2664_s20  ;;  %p2670_p6 = scmp.lt.s32.totalorder %s2664_s20, %s2664_s20 }
 0x271   :  { %v2250_v9 = vcombine.high %v1093_v47, %v1097_v48  ;;  %v2249_v51 = vcombine.low %v1093_v47, %v1097_v48 }
 0x272   :  { %p2671_p7 = por %p2670_p6, %p2669_p5 }
 0x273   :  { %1975 = vmatpush1.bf16.msra.mxu1 %v2247_v49  ;;  %v1101_v49 = vld [vmem:[#allocation8 + $0xd8] sm:$0xff] }
 0x274   :  { %1976 = vmatprep.subr.bf16.mxu1 %v2256_v50  ;;  %v1105_v50 = vld [vmem:[#allocation8 + $0xf8] sm:$0xff]  ;;  %p2672_p8 = pnand %p2671_p7, %p2665_p4 }
 0x275   :  { %v2258_v52 = vcombine.high %v1101_v49, %v1105_v50  ;;  %v2257_v55 = vcombine.low %v1101_v49, %v1105_v50 }
 0x277   :  { %1977 = vmatpush1.bf16.msra.mxu1 %v2255_v53  ;;  %v1109_v53 = vld [vmem:[#allocation8 + $0x118] sm:$0xff] }
 0x278   :  { %1978 = vmatprep.subr.bf16.mxu1 %v2264_v54  ;;  %v1113_v54 = vld [vmem:[#allocation8 + $0x138] sm:$0xff] }
 0x279   :  { %v2266_v56 = vcombine.high %v1109_v53, %v1113_v54  ;;  %v2265_v59 = vcombine.low %v1109_v53, %v1113_v54 }
 0x27b   :  { %1979 = vmatpush1.bf16.msra.mxu1 %v2263_v57  ;;  %v1117_v57 = vld [vmem:[#allocation8 + $0x158] sm:$0xff] }
 0x27c   :  { %1980 = vmatprep.subr.bf16.mxu1 %v2272_v58  ;;  %v1121_v58 = vld [vmem:[#allocation8 + $0x178] sm:$0xff] }
 0x27f   :  { %1981 = vmatpush1.bf16.msra.mxu1 %v2271_v61  ;;  %v1129_v61 = vld [vmem:[#allocation8 + $0x1b8] sm:$0xff] }
 0x280   :  { %1982 = vmatprep.subr.bf16.mxu1 %v2280_v62  ;;  %v2273_v62 = vcombine.low %v1117_v57, %v1121_v58  ;;  %v2282_v63 = vcombine.high %v1125_v60, %v1129_v61 }
 0x283   :  { %1983 = vmatpush1.bf16.msra.mxu1 %v2279_v1  ;;  %v1137_v1 = vld [vmem:[#allocation8 + $0x1f8] sm:$0xff] }
 0x284   :  { %1984 = vmatprep.subr.bf16.mxu1 %v2288_v2  ;;  %v2281_v2 = vcombine.low %v1125_v60, %v1129_v61  ;;  %v2290_v3 = vcombine.high %v1133_v0, %v1137_v1 }
 0x287   :  { %1985 = vmatpush1.bf16.msra.mxu1 %v2287_v5  ;;  %v1145_v5 = vld [vmem:[#allocation8 + $0x238] sm:$0xff] }
 0x288   :  { %1986 = vmatprep.subr.bf16.mxu1 %v2296_v6  ;;  %v2289_v6 = vcombine.low %v1133_v0, %v1137_v1  ;;  %v2298_v7 = vcombine.high %v1141_v4, %v1145_v5 }
 0x28b   :  { %1987 = vmatpush1.bf16.msra.mxu1 %v2295_v11  ;;  %v1153_v11 = vld [vmem:[#allocation8 + $0x278] sm:$0xff] }
 0x28c   :  { %1988 = vmatprep.subr.bf16.mxu1 %v2304_v12  ;;  %v2297_v12 = vcombine.low %v1141_v4, %v1145_v5  ;;  %v2306_v13 = vcombine.high %v1149_v10, %v1153_v11 }
 0x28f   :  { %1989 = vmatpush1.bf16.msra.mxu1 %v2303_v15  ;;  %v1161_v15 = vld [vmem:[#allocation8 + $0x2b8] sm:$0xff] }
 0x290   :  { %1990 = vmatprep.subr.bf16.mxu1 %v2312_v16  ;;  %v2305_v16 = vcombine.low %v1149_v10, %v1153_v11  ;;  %v2314_v17 = vcombine.high %v1157_v14, %v1161_v15 }
 0x293   :  { %1991 = vmatpush1.bf16.msra.mxu1 %v2311_v19  ;;  %v1169_v19 = vld [vmem:[#allocation8 + $0x2f8] sm:$0xff] }
 0x294   :  { %1992 = vmatprep.subr.bf16.mxu1 %v2320_v20  ;;  %v2313_v20 = vcombine.low %v1157_v14, %v1161_v15  ;;  %v2322_v21 = vcombine.high %v1165_v18, %v1169_v19 }
 0x297   :  { %1993 = vmatpush1.bf16.msra.mxu1 %v2319_v23  ;;  %v1177_v23 = vld [vmem:[#allocation8 + $0x338] sm:$0xff] }
 0x298   :  { %1994 = vmatprep.subr.bf16.mxu1 %v2328_v24  ;;  %v2321_v24 = vcombine.low %v1165_v18, %v1169_v19  ;;  %v2330_v25 = vcombine.high %v1173_v22, %v1177_v23 }
 0x29b   :  { %1995 = vmatpush1.bf16.msra.mxu1 %v2327_v27  ;;  %v1185_v27 = vld [vmem:[#allocation8 + $0x378] sm:$0xff] }
 0x29c   :  { %1996 = vmatprep.subr.bf16.mxu1 %v2336_v28  ;;  %v2329_v28 = vcombine.low %v1173_v22, %v1177_v23  ;;  %v2338_v29 = vcombine.high %v1181_v26, %v1185_v27 }
 0x29f   :  { %1997 = vmatpush1.bf16.msra.mxu1 %v2335_v31  ;;  %v1193_v31 = vld [vmem:[#allocation8 + $0x3b8] sm:$0xff] }
 0x2a0   :  { %1998 = vmatprep.subr.bf16.mxu1 %v2344_v32  ;;  %v2337_v32 = vcombine.low %v1181_v26, %v1185_v27  ;;  %v2346_v33 = vcombine.high %v1189_v30, %v1193_v31 }
 0x2a3   :  { %1999 = vmatpush1.bf16.msra.mxu1 %v2343_v35  ;;  %v1201_v35 = vld [vmem:[#allocation8 + $0x3f8] sm:$0xff] }
 0x2a4   :  { %2000 = vmatprep.subr.bf16.mxu1 %v2352_v36  ;;  %v2345_v36 = vcombine.low %v1189_v30, %v1193_v31  ;;  %v2354_v37 = vcombine.high %v1197_v34, %v1201_v35  ;;  %v2353_v38 = vcombine.low %v1197_v34, %v1201_v35 }
 0x2a7   :  { %2001 = vmatpush1.bf16.msra.mxu1 %v2351_v39  ;;  %v1204_v39 = vlaneseq }
 0x2a8   :  { %2013 = vmatprep.subr.bf16.mxu1 %v2234_v42 }
 0x2a9   :  { %v1205_v42 = vshrl.u32 %v1204_v39, 7 }
 0x2aa   :  { %2003 = vmatmul.mubr.bf16.vlgmr.msra.gmra.mrb[8].mxu1 %v2815_v40 }
 0x2ab   :  { %2014 = vmatpush1.bf16.msra.mxu1 %v2233_v45  ;;  %2045 = vmatprep.mubr.bf16.mxu1 %v2817_v41  ;;  %v2274_v41 = vcombine.high %v1117_v57, %v1121_v58  ;;  %v1206_v43 = vsub.s32 0, %v1205_v42  ;;  %v1210_v45 = vsub.s32 1, %v1205_v42  ;;  %v1214_v53 = vsub.s32 2, %v1205_v42 }
 0x2ac   :  { %2015 = vmatprep.subr.bf16.mxu1 %v2242_v46  ;;  %v1218_v54 = vsub.s32 3, %v1205_v42  ;;  %v1222_v0 = vsub.s32 4, %v1205_v42  ;;  %v1226_v1 = vsub.s32 5, %v1205_v42  ;;  %v1230_v14 = vsub.s32 6, %v1205_v42 }
 0x2ad   :  { %v1207_v46 = vrot.slane %v1202_v44, %v1206_v43  ;;  %v1211_v47 = vrot.slane %v1202_v44, %v1210_v45  ;;  %v1234_v15 = vsub.s32 7, %v1205_v42 }
 0x2af   :  { %2016 = vmatpush1.bf16.msra.mxu1 %v2241_v8 }
 0x2b0   :  { %2017 = vmatprep.subr.bf16.mxu1 %v2250_v9 }
 0x2b3   :  { %2018 = vmatpush1.bf16.msra.mxu1 %v2249_v51 }
 0x2b4   :  { %2019 = vmatprep.subr.bf16.mxu1 %v2258_v52 }
 0x2b7   :  { %2020 = vmatpush1.bf16.msra.mxu1 %v2257_v55  ;;  %v1215_v55 = vrot.slane %v1202_v44, %v1214_v53 }
 0x2b8   :  { %2021 = vmatprep.subr.bf16.mxu1 %v2266_v56  ;;  %v1219_v56 = vrot.slane %v1202_v44, %v1218_v54 }
 0x2bb   :  { %2022 = vmatpush1.bf16.msra.mxu1 %v2265_v59 }
 0x2bc   :  { %2023 = vmatprep.subr.bf16.mxu1 %v2274_v41 }
 0x2bf   :  { %2024 = vmatpush1.bf16.msra.mxu1 %v2273_v62 }
 0x2c0   :  { %2025 = vmatprep.subr.bf16.mxu1 %v2282_v63 }
 0x2c3   :  { %2026 = vmatpush1.bf16.msra.mxu1 %v2281_v2  ;;  %v1223_v2 = vrot.slane %v1202_v44, %v1222_v0 }
 0x2c4   :  { %2027 = vmatprep.subr.bf16.mxu1 %v2290_v3  ;;  %v1227_v3 = vrot.slane %v1202_v44, %v1226_v1 }
 0x2c7   :  { %2028 = vmatpush1.bf16.msra.mxu1 %v2289_v6 }
 0x2c8   :  { %2029 = vmatprep.subr.bf16.mxu1 %v2298_v7 }
 0x2cb   :  { %2030 = vmatpush1.bf16.msra.mxu1 %v2297_v12 }
 0x2cc   :  { %2031 = vmatprep.subr.bf16.mxu1 %v2306_v13 }
 0x2cf   :  { %2032 = vmatpush1.bf16.msra.mxu1 %v2305_v16  ;;  %v1231_v16 = vrot.slane %v1202_v44, %v1230_v14 }
 0x2d0   :  { %2033 = vmatprep.subr.bf16.mxu1 %v2314_v17  ;;  %v1235_v17 = vrot.slane %v1202_v44, %v1234_v15 }
 0x2d3   :  { %2034 = vmatpush1.bf16.msra.mxu1 %v2313_v20 }
 0x2d4   :  { %2035 = vmatprep.subr.bf16.mxu1 %v2322_v21 }
 0x2d7   :  { %2036 = vmatpush1.bf16.msra.mxu1 %v2321_v24 }
 0x2d8   :  { %2037 = vmatprep.subr.bf16.mxu1 %v2330_v25 }
 0x2db   :  { %2038 = vmatpush1.bf16.msra.mxu1 %v2329_v28 }
 0x2dc   :  { %2039 = vmatprep.subr.bf16.mxu1 %v2338_v29 }
 0x2df   :  { %2040 = vmatpush1.bf16.msra.mxu1 %v2337_v32 }
 0x2e0   :  { %2041 = vmatprep.subr.bf16.mxu1 %v2346_v33 }
 0x2e3   :  { %2042 = vmatpush1.bf16.msra.mxu1 %v2345_v36 }
 0x2e4   :  { %2043 = vmatprep.subr.bf16.mxu1 %v2354_v37 }
 0x2e7   :  { %2044 = vmatpush1.bf16.msra.mxu1 %v2353_v38 }
 0x2ea   :  { %2046 = vmatmul.mubr.bf16.vlgmr.msra.gmra.mrb[12].mxu1 %v2815_v40 }
 0x2fd   :  { %v1918_v48 = vpop.f32.mrb[0].mxu1 }
 0x2fe   :  { %v1919_v8 = vadd.f32 %v1918_v48, %v1207_v46  ;;  %v1920_v9 = vpop.f32.mrb[1].mxu1 }
 0x2ff   :  { %v1921_v49 = vadd.f32 %v1920_v9, %v1211_v47  ;;  %v1922_v50 = vpop.f32.mrb[2].mxu1 }
 0x300   :  { %2056 = vst [vmem:[#allocation10] sm:$0xff] %v1919_v8  ;;  %v1923_v51 = vadd.f32 %v1922_v50, %v1207_v46  ;;  %v1924_v52 = vpop.f32.mrb[3].mxu1 }
 0x301   :  { %2057 = vst [vmem:[#allocation10 + $0x8] sm:$0xff] %v1921_v49  ;;  %v1925_v40 = vadd.f32 %v1924_v52, %v1211_v47 }
 0x302   :  { %2064 = vst [vmem:[#allocation10 + $0x40] sm:$0xff] %v1923_v51 }
 0x303   :  { %2065 = vst [vmem:[#allocation10 + $0x48] sm:$0xff] %v1925_v40 }
 0x33d   :  { %v1961_v57 = vpop.f32.mrb[4].mxu1 }
 0x33e   :  { %v1962_v58 = vadd.f32 %v1961_v57, %v1215_v55  ;;  %v1963_v59 = vpop.f32.mrb[5].mxu1 }
 0x33f   :  { %v1964_v41 = vadd.f32 %v1963_v59, %v1219_v56  ;;  %v1965_v60 = vpop.f32.mrb[6].mxu1 }
 0x340   :  { %2058 = vst [vmem:[#allocation10 + $0x10] sm:$0xff] %v1962_v58  ;;  %v1966_v61 = vadd.f32 %v1965_v60, %v1215_v55  ;;  %v1967_v62 = vpop.f32.mrb[7].mxu1 }
 0x341   :  { %2059 = vst [vmem:[#allocation10 + $0x18] sm:$0xff] %v1964_v41  ;;  %v1968_v63 = vadd.f32 %v1967_v62, %v1219_v56 }
 0x342   :  { %2066 = vst [vmem:[#allocation10 + $0x50] sm:$0xff] %v1966_v61 }
 0x343   :  { %2067 = vst [vmem:[#allocation10 + $0x58] sm:$0xff] %v1968_v63 }
 0x37d   :  { %v2004_v4 = vpop.f32.mrb[8].mxu1 }
 0x37e   :  { %v2005_v5 = vadd.f32 %v2004_v4, %v1223_v2  ;;  %v2006_v6 = vpop.f32.mrb[9].mxu1 }
 0x37f   :  { %v2007_v7 = vadd.f32 %v2006_v6, %v1227_v3  ;;  %v2008_v10 = vpop.f32.mrb[10].mxu1 }
 0x380   :  { %2060 = vst [vmem:[#allocation10 + $0x20] sm:$0xff] %v2005_v5  ;;  %v2009_v11 = vadd.f32 %v2008_v10, %v1223_v2  ;;  %v2010_v12 = vpop.f32.mrb[11].mxu1 }
 0x381   :  { %2061 = vst [vmem:[#allocation10 + $0x28] sm:$0xff] %v2007_v7  ;;  %v2011_v13 = vadd.f32 %v2010_v12, %v1227_v3 }
 0x382   :  { %2068 = vst [vmem:[#allocation10 + $0x60] sm:$0xff] %v2009_v11 }
 0x383   :  { %2069 = vst [vmem:[#allocation10 + $0x68] sm:$0xff] %v2011_v13 }
 0x3bd   :  { %v2047_v18 = vpop.f32.mrb[12].mxu1 }
 0x3be   :  { %v2048_v19 = vadd.f32 %v2047_v18, %v1231_v16  ;;  %v2049_v20 = vpop.f32.mrb[13].mxu1 }
 0x3bf   :  { %v2050_v21 = vadd.f32 %v2049_v20, %v1235_v17  ;;  %v2051_v22 = vpop.f32.mrb[14].mxu1 }
 0x3c0   :  { %2062 = vst [vmem:[#allocation10 + $0x30] sm:$0xff] %v2048_v19  ;;  %v2052_v23 = vadd.f32 %v2051_v22, %v1231_v16  ;;  %v2053_v24 = vpop.f32.mrb[15].mxu1 }
 0x3c1   :  { %2063 = vst [vmem:[#allocation10 + $0x38] sm:$0xff] %v2050_v21  ;;  %v2054_v25 = vadd.f32 %v2053_v24, %v1235_v17 }
 0x3c2   :  { %2070 = vst [vmem:[#allocation10 + $0x70] sm:$0xff] %v2052_v23 }
 0x3c3   :  { %2071 = vst [vmem:[#allocation10 + $0x78] sm:$0xff] %v2054_v25 }
 0x3c4   :  { %2675 = shalt.err (!%p2672_p8)
}
 0x3c5   :  { %s2676_s23 = scalar_lea.hbm %s2847_s5, 2048 }
 0x3c6   :  { %p2677_p9 = scmp.ne.s32.totalorder %s2847_s5, %s2676_s23  ;;  %p2680_p10 = scmp.lt.u32.totalorder %s2676_s23, %s2847_s5 }
 0x3c8   :  { %p2682_p11 = pnand %p2680_p10, %p2677_p9 }
 0x3ca   :  { %2685 = shalt.err (!%p2682_p11)
}
 0x3cb   :  { %s2705_s28 = smov 1024   ;;  %s2706_s29 = smov 64  }
 0x3cc   :  { %2083 = dma.vmem_to_hbm [thread:$0]  %s2078_s17, 2048, %s2847_s5, [#allocation4], %s2705_s28, %s2705_s28, %s2706_s29  }
 0x3cd   :  { %2692 = dma.done.wait [#allocation4], 2048  }
 0x3ce   :  { %2693 = vsyncadd [#allocation4], 4294965248 }
 0x3cf   :  { %2087 = vsyncpa [#allocation3], 1 }
 0x3d0   :  { %2088 = vsyncpa [#allocation6], 1 }
 0x3d1   :  { %2089 = vsyncpa [#allocation9], 1 }
 0x3d2   :  { %2090 = vsyncpa [#allocation4], 1 }

</bundles_post_ra>
